<compile_context>
chip_gen: v7x
topology: tpu7x:2x2x1
jax: 0.10.0
libtpu: 0.0.40
codegen_flags: <defaults>
</compile_context>

<pallas_src>
import math
from functools import partial

import jax
import jax.numpy as jnp
from jax import lax
from jax.experimental import pallas as pl
from jax.experimental.pallas import tpu as pltpu


def _round_up(x, m):
    return ((x + m - 1) // m) * m


# -----------------------------------------------------------------------------
# Pallas kernel: EMA vector quantizer forward (nearest-code lookup + statistics)
# -----------------------------------------------------------------------------
def vq_kernel(nvalid_ref, x_ref, whi_ref, wlo_ref, w2_ref,
              q_ref, idx_ref, counts_ref, dw_ref, sse_ref):
    c = pl.program_id(0)      # per-core partial index ("parallel")
    g = pl.program_id(1)      # row-tile index within this core ("arbitrary")
    gpc = pl.num_programs(1)

    # Zero this core's accumulator blocks at its first tile.
    @pl.when(g == 0)
    def _init():
        counts_ref[...] = jnp.zeros_like(counts_ref)
        dw_ref[...] = jnp.zeros_like(dw_ref)
        sse_ref[...] = jnp.zeros_like(sse_ref)

    x = x_ref[...]                                   # [TN, D] f32
    x_bf = x.astype(jnp.bfloat16)                    # reused by dist + dw matmuls
    w_hi = whi_ref[...]                              # [K, D] bf16 (resident)
    w_lo = wlo_ref[...]                              # [K, D] bf16 residual (resident)
    w2 = w2_ref[...]                                 # [K, 1] f32 (padded codes ~1e30)

    TN = x_ref.shape[0]
    K = whi_ref.shape[0]

    # Distance matrix, transposed ([codes, rows]) so the argmin result lands
    # lane-dense.  bf16 operands, f32 accumulation on the MXU; ||x||^2 is
    # dropped (row-constant for the argmin); ||w||^2 was hoisted to the wrapper.
    xwT = lax.dot_general(w_hi, x_bf, (((1,), (1,)), ((), ())),
                          preferred_element_type=jnp.float32)        # [K, TN]
    dist = w2 - 2.0 * xwT

    # First-index argmin over codes (matches torch.argmin tie-breaking).
    dmin = jnp.min(dist, axis=0, keepdims=True)                      # [1, TN]
    code_iota = lax.broadcasted_iota(jnp.int32, (K, TN), 0)          # [K, TN]
    idx_row = jnp.min(jnp.where(dist == dmin, code_iota, K),
                      axis=0, keepdims=True)                         # [1, TN] i32

    # Mask rows that only exist because N was padded up to a tile multiple.
    n_valid = nvalid_ref[0]
    row0 = (c * gpc + g) * TN
    col = row0 + lax.broadcasted_iota(jnp.int32, (1, TN), 1)         # [1, TN]
    valid = col < n_valid

    # One-hot encodings in bf16 ({0,1} -> exact), transposed: [codes, rows].
    encT = ((code_iota == idx_row) & valid).astype(jnp.bfloat16)     # [K, TN]

    # quantized rows = enc @ (w_hi + w_lo): two single-pass bf16 MXU matmuls
    # with f32 accumulation -> near-f32 codebook rows, no resident f32 codebook.
    q = lax.dot_general(encT, w_hi, (((0,), (0,)), ((), ())),
                        preferred_element_type=jnp.float32)
    q = q + lax.dot_general(encT, w_lo, (((0,), (0,)), ((), ())),
                            preferred_element_type=jnp.float32)      # [TN, D]

    # per-code counts via an MXU ones-matmul (exact; keeps the XLU slot free).
    ones_row = jnp.ones((1, TN), jnp.bfloat16)
    counts = lax.dot_general(ones_row, encT, (((1,), (1,)), ((), ())),
                             preferred_element_type=jnp.float32)     # [1, K]

    # dw = enc^T @ x: bf16 operands + f32 accumulation (single MXU pass; the
    # downstream EMA decay makes bf16-level input rounding acceptable).
    dw = lax.dot_general(encT, x_bf, (((1,), (0,)), ((), ())),
                         preferred_element_type=jnp.float32)         # [K, D]

    # sum((quantized - x)^2); padded rows have x == 0 and q == 0 -> contribute 0.
    diff = q - x
    sse = jnp.sum(jnp.sum(diff * diff, axis=1, keepdims=True),
                  axis=0, keepdims=True)                             # [1, 1]

    # TODO(synk): on v6e/v7x a bf16 q_ref dtype halves the write-back traffic if
    # the straight-through estimator tolerates it (pass q_dtype=jnp.bfloat16).
    q_ref[...] = q.astype(q_ref.dtype)
    idx_ref[...] = idx_row
    counts_ref[0] += counts
    dw_ref[0] += dw
    sse_ref[0] += sse


def vq_forward(flat_x, codebook, *, tn=512, q_dtype=jnp.float32):
    """flat_x: [N, D], codebook: [K, D].

    Returns (quantized [N, D] f32, indices [N] i32, counts [K], dw [K, D], sse ()).
    """
    N, D = flat_x.shape
    K = codebook.shape[0]

    D_pad = _round_up(D, 128)
    K_pad = _round_up(K, 128)

    # Row tile: default 512 (sweep 512-1024 per TPU generation for large N),
    # clamped to what the problem needs, kept a multiple of 128.
    tn = max(128, min(_round_up(tn, 128), _round_up(N, 128)))

    # Split row tiles across (up to) two TensorCores; each core accumulates its
    # own counts/dw/sse partial which the wrapper reduces (the constant-block
    # accumulator pattern is not valid under a "parallel" axis).
    g_needed = _round_up(N, tn) // tn
    nc = 2 if g_needed >= 2 else 1
    g_total = _round_up(g_needed, nc)
    gpc = g_total // nc
    N_pad = g_total * tn

    x_f32 = flat_x.astype(jnp.float32)
    if N_pad != N or D_pad != D:
        x_p = jnp.pad(x_f32, ((0, N_pad - N), (0, D_pad - D)))
    else:
        x_p = x_f32                                   # no extra HBM copy

    w_f32 = codebook.astype(jnp.float32)
    if K_pad != K or D_pad != D:
        w_f32 = jnp.pad(w_f32, ((0, K_pad - K), (0, D_pad - D)))
    # hi/lo bf16 split (hoisted out of the per-tile path); w_hi + w_lo
    # reconstructs the f32 codebook to ~2^-16 relative error.
    w_hi = w_f32.astype(jnp.bfloat16)
    w_lo = (w_f32 - w_hi.astype(jnp.float32)).astype(jnp.bfloat16)

    # ||w||^2 per code; padded codes get a huge value so they never win argmin.
    w2 = jnp.sum(w_f32 * w_f32, axis=1, keepdims=True)
    w2 = jnp.where(jnp.arange(K_pad)[:, None] < K, w2, jnp.float32(1e30))

    n_valid = jnp.array([N], jnp.int32)               # SMEM scalar prefetch

    out_shape = (
        jax.ShapeDtypeStruct((N_pad, D_pad), q_dtype),          # quantized
        jax.ShapeDtypeStruct((1, N_pad), jnp.int32),            # indices
        jax.ShapeDtypeStruct((nc, 1, K_pad), jnp.float32),      # per-core counts
        jax.ShapeDtypeStruct((nc, K_pad, D_pad), jnp.float32),  # per-core dw
        jax.ShapeDtypeStruct((nc, 1, 1), jnp.float32),          # per-core sse
    )

    # Explicit VMEM budget: double-buffered x/q/idx tiles, resident bf16
    # codebooks + ||w||^2, dw/counts accumulator blocks, and the [K, TN]
    # distance / encoding temporaries.  Capped at 64 MiB (v7x physical VMEM).
    qb = jnp.dtype(q_dtype).itemsize
    vmem_est = (2 * tn * D_pad * 4              # x tiles (double-buffered)
                + 2 * tn * D_pad * qb           # q tiles (double-buffered)
                + 2 * tn * 4                    # idx tiles
                + 2 * 2 * K_pad * D_pad * 2     # w_hi + w_lo (bf16)
                + 2 * K_pad * 128 * 4           # ||w||^2 (lane-padded)
                + 2 * K_pad * D_pad * 4         # dw accumulator block
                + 2 * 8 * K_pad * 4             # counts block
                + 6 * K_pad * tn * 4            # dist / encT / iota temporaries
                + 3 * tn * D_pad * 4)           # x_bf16 / q / diff temporaries
    vmem_limit = int(min(max(vmem_est, 32 * 1024 * 1024), 64 * 1024 * 1024))

    # TODO(synk): on v7x, if xprof shows exposed DMA at large TN, add
    # pipeline_mode=pl.Buffered(3) on the x / q BlockSpecs.
    grid_spec = pltpu.PrefetchScalarGridSpec(
        num_scalar_prefetch=1,
        grid=(nc, gpc),
        in_specs=[
            pl.BlockSpec((tn, D_pad), lambda c, g, nv: (c * gpc + g, 0)),   # x
            pl.BlockSpec((K_pad, D_pad), lambda c, g, nv: (0, 0)),          # w_hi
            pl.BlockSpec((K_pad, D_pad), lambda c, g, nv: (0, 0)),          # w_lo
            pl.BlockSpec((K_pad, 1), lambda c, g, nv: (0, 0)),              # ||w||^2
        ],
        out_specs=(
            pl.BlockSpec((tn, D_pad), lambda c, g, nv: (c * gpc + g, 0)),   # q
            pl.BlockSpec((1, tn), lambda c, g, nv: (0, c * gpc + g)),       # idx
            pl.BlockSpec((1, 1, K_pad), lambda c, g, nv: (c, 0, 0)),        # counts
            pl.BlockSpec((1, K_pad, D_pad), lambda c, g, nv: (c, 0, 0)),    # dw
            pl.BlockSpec((1, 1, 1), lambda c, g, nv: (c, 0, 0)),            # sse
        ),
    )

    q_p, idx_p, counts_p, dw_p, sse_p = pl.pallas_call(
        vq_kernel,
        out_shape=out_shape,
        grid_spec=grid_spec,
        compiler_params=pltpu.CompilerParams(
            dimension_semantics=("parallel", "arbitrary"),
            vmem_limit_bytes=vmem_limit),
    )(n_valid, x_p, w_hi, w_lo, w2)

    counts = jnp.sum(counts_p, axis=0)[0, :K]
    dw = jnp.sum(dw_p, axis=0)[:K, :D]
    sse = jnp.sum(sse_p)
    return (q_p[:N, :D].astype(jnp.float32), idx_p[0, :N], counts, dw, sse)


# -----------------------------------------------------------------------------
# Deterministic stand-in for TransformerDocumentEncoder (plain JAX glue).
# [B, S, T, E] -> [B, S, E]
# -----------------------------------------------------------------------------
def layer_norm(x, g, b, eps=1e-5):
    mu = x.mean(-1, keepdims=True)
    var = ((x - mu) ** 2).mean(-1, keepdims=True)
    return (x - mu) / jnp.sqrt(var + eps) * g + b


def init_encoder_params(key, d_model, nlayers, n_heads_out, d_ff):
    params = {"layers": []}
    scale = 1.0 / math.sqrt(d_model)
    keys = jax.random.split(key, nlayers * 6 + 2)
    ki = 0
    for _ in range(nlayers):
        lp = {
            "Wq": jax.random.normal(keys[ki + 0], (d_model, d_model), jnp.float32) * scale,
            "Wk": jax.random.normal(keys[ki + 1], (d_model, d_model), jnp.float32) * scale,
            "Wv": jax.random.normal(keys[ki + 2], (d_model, d_model), jnp.float32) * scale,
            "Wo": jax.random.normal(keys[ki + 3], (d_model, d_model), jnp.float32) * scale,
            "W1": jax.random.normal(keys[ki + 4], (d_model, d_ff), jnp.float32) * scale,
            "W2": jax.random.normal(keys[ki + 5], (d_ff, d_model), jnp.float32) / math.sqrt(d_ff),
            "g1": jnp.ones((d_model,), jnp.float32), "b1": jnp.zeros((d_model,), jnp.float32),
            "g2": jnp.ones((d_model,), jnp.float32), "b2": jnp.zeros((d_model,), jnp.float32),
        }
        params["layers"].append(lp)
        ki += 6
    d_head_out = d_model // n_heads_out
    params["pool_A"] = jax.random.normal(keys[ki], (n_heads_out, d_model), jnp.float32) * scale
    params["pool_W"] = jax.random.normal(
        keys[ki + 1], (n_heads_out, d_model, d_head_out), jnp.float32) * scale
    return params


def encoder_forward(x, params, internal_nheads):
    # x: [B, S, T, E]; dropout is identity (eval semantics).
    B, S, T, E = x.shape
    h = internal_nheads
    dh = E // h
    M = B * S * T
    for lp in params["layers"]:
        # Batch all projections as a single [B*S*T, E] matmul.
        x2d = x.reshape(M, E)
        q = (x2d @ lp["Wq"]).reshape(B, S, T, h, dh)
        k = (x2d @ lp["Wk"]).reshape(B, S, T, h, dh)
        v = (x2d @ lp["Wv"]).reshape(B, S, T, h, dh)
        scores = jnp.einsum("bsthd,bsuhd->bshtu", q, k) / math.sqrt(dh)
        attn = jax.nn.softmax(scores, axis=-1)
        o = jnp.einsum("bshtu,bsuhd->bsthd", attn, v).reshape(M, E)
        x2d = layer_norm(x2d + o @ lp["Wo"], lp["g1"], lp["b1"])
        ff = jax.nn.relu(x2d @ lp["W1"]) @ lp["W2"]
        x2d = layer_norm(x2d + ff, lp["g2"], lp["b2"])
        x = x2d.reshape(B, S, T, E)
    # multi-head attention pooling over tokens
    A, Wp = params["pool_A"], params["pool_W"]          # [H, E], [H, E, dh_out]
    scores = jnp.einsum("bste,he->bsht", x, A)
    alpha = jax.nn.softmax(scores, axis=-1)
    heads = jnp.einsum("bste,hed->bshtd", x, Wp)
    pooled = jnp.einsum("bsht,bshtd->bshd", alpha, heads)
    return pooled.reshape(B, S, -1)                     # [B, S, E]


# -----------------------------------------------------------------------------
# Full module forward (quantize=True, residual_coeff=0.0, no padding mask)
# -----------------------------------------------------------------------------
def transformer_document_quantizer_forward(inputs, enc_params, codebook,
                                           ema_cluster_size, ema_w,
                                           internal_nheads=4,
                                           commitment_cost=0.25,
                                           decay=0.99, epsilon=1e-5):
    B, S, T, E = inputs.shape
    out = encoder_forward(inputs, enc_params, internal_nheads)      # [B, S, E]
    flat = out.reshape(-1, E)                                       # [N, E]
    N = flat.shape[0]
    K = codebook.shape[0]

    q_flat, idx, counts, dw, sse = vq_forward(flat, codebook)

    quantized = q_flat.reshape(B, S, E)
    e_latent_loss = sse / (N * E)                                   # mean sq err
    loss = commitment_cost * e_latent_loss

    avg_probs = counts / N
    perplexity = jnp.exp(-jnp.sum(avg_probs * jnp.log(avg_probs + 1e-10)))

    # straight-through estimator: inputs + (quantized - inputs).detach()
    quantized_st = out + lax.stop_gradient(quantized - out)
    encoding_indices = idx.reshape(B, S)                             # int32

    # EMA buffer updates (functional equivalents of the in-place torch updates)
    new_cluster = ema_cluster_size * decay + (1.0 - decay) * counts
    n = jnp.sum(new_cluster)
    new_cluster = (new_cluster + epsilon) / (n + K * epsilon) * n
    new_ema_w = ema_w * decay + (1.0 - decay) * dw
    new_codebook = new_ema_w / new_cluster[:, None]

    return (quantized_st, encoding_indices, loss, perplexity,
            new_cluster, new_ema_w, new_codebook)


if __name__ == "__main__":
    # Small shapes consistent with the module: inputs [B, S, T, E]
    B, S, T = 2, 8, 8
    d_model = 128
    codebook_size = 64
    nlayers = 2
    internal_nheads = 4
    output_nheads = 4
    d_ff = 256

    key = jax.random.PRNGKey(0)
    k_in, k_enc, k_cb = jax.random.split(key, 3)

    inputs = jax.random.normal(k_in, (B, S, T, d_model), jnp.float32)
    enc_params = init_encoder_params(k_enc, d_model, nlayers, output_nheads, d_ff)
    codebook = jax.random.normal(k_cb, (codebook_size, d_model), jnp.float32)
    ema_cluster_size = jnp.zeros((codebook_size,), jnp.float32)
    ema_w = codebook.copy()

    fwd = jax.jit(partial(transformer_document_quantizer_forward,
                          internal_nheads=internal_nheads,
                          commitment_cost=0.25))
    outs = fwd(inputs, enc_params, codebook, ema_cluster_size, ema_w)

    quantized, encodings, loss, perplexity = outs[0], outs[1], outs[2], outs[3]
    jax.block_until_ready((quantized, encodings, loss, perplexity))

    assert quantized.shape == (B, S, d_model)
    assert encodings.shape == (B, S)
    assert encodings.dtype == jnp.int32
    assert jnp.isfinite(loss) and jnp.isfinite(perplexity)
    assert bool(jnp.all(encodings >= 0)) and bool(jnp.all(encodings < codebook_size))
    print("KERNEL_OK")
</pallas_src>

<mosaic_0001>
module attributes {stable_mosaic.version = 11 : i64} {
  func.func @vq_kernel(%arg0: i32, %arg1: i32, %arg2: memref<1xi32, #tpu.memory_space<smem>>, %arg3: memref<128x128xf32, #tpu.memory_space<vmem>>, %arg4: memref<128x128xbf16, #tpu.memory_space<vmem>>, %arg5: memref<128x128xbf16, #tpu.memory_space<vmem>>, %arg6: memref<128x1xf32, #tpu.memory_space<vmem>>, %arg7: memref<128x128xf32, #tpu.memory_space<vmem>>, %arg8: memref<1x128xi32, #tpu.memory_space<vmem>>, %arg9: memref<1x1x128xf32, #tpu.memory_space<vmem>>, %arg10: memref<1x128x128xf32, #tpu.memory_space<vmem>>, %arg11: memref<1x1x1xf32, #tpu.memory_space<vmem>>) attributes {dimension_semantics = [#tpu.dimension_semantics<parallel>, #tpu.dimension_semantics<arbitrary>], iteration_bounds = array<i64: 1, 1>, scalar_prefetch = 1 : i64, scratch_operands = 0 : i64, tpu.core_type = #tpu.core_type<tc>, window_params = [{transform_indices = @transform_0, window_bounds = array<i64: 128, 128>}, {pipeline_mode = #tpu.pipeline_mode<synchronous>, transform_indices = @transform_1, window_bounds = array<i64: 128, 128>}, {pipeline_mode = #tpu.pipeline_mode<synchronous>, transform_indices = @transform_2, window_bounds = array<i64: 128, 128>}, {pipeline_mode = #tpu.pipeline_mode<synchronous>, transform_indices = @transform_3, window_bounds = array<i64: 128, 1>}, {transform_indices = @transform_4, window_bounds = array<i64: 128, 128>}, {transform_indices = @transform_5, window_bounds = array<i64: 1, 128>}, {transform_indices = @transform_6, window_bounds = array<i64: 1, 1, 128>}, {transform_indices = @transform_7, window_bounds = array<i64: 1, 128, 128>}, {transform_indices = @transform_8, window_bounds = array<i64: 1, 1, 1>}]} {
    %c0_i32 = arith.constant 0 : i32
    %0 = arith.cmpi eq, %arg1, %c0_i32 : i32
    %1 = arith.extui %0 : i1 to i32
    %c0_i32_0 = arith.constant 0 : i32
    %2 = arith.cmpi ne, %1, %c0_i32_0 : i32
    scf.if %2 {
      %cst_42 = arith.constant 0.000000e+00 : f32
      %70 = vector.broadcast %cst_42 : f32 to vector<1x1x128xf32>
      %c0_43 = arith.constant 0 : index
      %c0_44 = arith.constant 0 : index
      %c0_45 = arith.constant 0 : index
      %71 = vector.load %arg9[%c0_43, %c0_44, %c0_45] : memref<1x1x128xf32, #tpu.memory_space<vmem>>, vector<1x1x128xf32>
      tpu.vector_store %arg9[%c0_43, %c0_44, %c0_45], %70 {strides = array<i32>} : memref<1x1x128xf32, #tpu.memory_space<vmem>>, vector<1x1x128xf32>,
      %cst_46 = arith.constant 0.000000e+00 : f32
      %72 = vector.broadcast %cst_46 : f32 to vector<1x128x128xf32>
      %c0_47 = arith.constant 0 : index
      %c0_48 = arith.constant 0 : index
      %c0_49 = arith.constant 0 : index
      %73 = vector.load %arg10[%c0_47, %c0_48, %c0_49] : memref<1x128x128xf32, #tpu.memory_space<vmem>>, vector<1x128x128xf32>
      tpu.vector_store %arg10[%c0_47, %c0_48, %c0_49], %72 {strides = array<i32>} : memref<1x128x128xf32, #tpu.memory_space<vmem>>, vector<1x128x128xf32>,
      %cst_50 = arith.constant 0.000000e+00 : f32
      %74 = vector.broadcast %cst_50 : f32 to vector<1x1x1xf32>
      %c0_51 = arith.constant 0 : index
      %c0_52 = arith.constant 0 : index
      %c0_53 = arith.constant 0 : index
      %75 = vector.load %arg11[%c0_51, %c0_52, %c0_53] : memref<1x1x1xf32, #tpu.memory_space<vmem>>, vector<1x1x1xf32>
      tpu.vector_store %arg11[%c0_51, %c0_52, %c0_53], %74 {strides = array<i32>} : memref<1x1x1xf32, #tpu.memory_space<vmem>>, vector<1x1x1xf32>,
    } else {
    }
    %c0 = arith.constant 0 : index
    %c0_1 = arith.constant 0 : index
    %3 = vector.load %arg3[%c0, %c0_1] : memref<128x128xf32, #tpu.memory_space<vmem>>, vector<128x128xf32>
    %4 = arith.truncf %3 : vector<128x128xf32> to vector<128x128xbf16>
    %c0_2 = arith.constant 0 : index
    %c0_3 = arith.constant 0 : index
    %5 = vector.load %arg4[%c0_2, %c0_3] : memref<128x128xbf16, #tpu.memory_space<vmem>>, vector<128x128xbf16>
    %c0_4 = arith.constant 0 : index
    %c0_5 = arith.constant 0 : index
    %6 = vector.load %arg5[%c0_4, %c0_5] : memref<128x128xbf16, #tpu.memory_space<vmem>>, vector<128x128xbf16>
    %c0_6 = arith.constant 0 : index
    %c0_7 = arith.constant 0 : index
    %7 = vector.load %arg6[%c0_6, %c0_7] : memref<128x1xf32, #tpu.memory_space<vmem>>, vector<128x1xf32>
    %cst = arith.constant dense<0.000000e+00> : vector<128x128xf32>
    %8 = tpu.matmul %5, %4, %cst {dimension_numbers = #tpu.dot_dimension_numbers<[1], [1], [0], [0], [0, 0, 1, 0], [], []>} : vector<128x128xbf16>, vector<128x128xbf16>, vector<128x128xf32> -> vector<128x128xf32>
    %cst_8 = arith.constant 2.000000e+00 : f32
    %9 = vector.broadcast %cst_8 : f32 to vector<128x128xf32>
    %10 = arith.mulf %9, %8 : vector<128x128xf32>
    %11 = vector.broadcast %7 : vector<128x1xf32> to vector<128x128xf32>
    %12 = arith.subf %11, %10 : vector<128x128xf32>
    %cst_9 = arith.constant dense<0x7F800000> : vector<128xf32>
    %13 = vector.multi_reduction <minimumf>, %12, %cst_9 [0] : vector<128x128xf32> to vector<128xf32>
    %14 = vector.shape_cast %13 : vector<128xf32> to vector<1x128xf32>
    %15 = tpu.iota {dimensions = array<i32: 0>} : vector<128x128xi32>
    %16 = vector.broadcast %14 : vector<1x128xf32> to vector<128x128xf32>
    %17 = arith.cmpf oeq, %12, %16 : vector<128x128xf32>
    %c128_i32 = arith.constant 128 : i32
    %18 = vector.broadcast %c128_i32 : i32 to vector<128x128xi32>
    %19 = arith.select %17, %15, %18 : vector<128x128xi1>, vector<128x128xi32>
    %cst_10 = arith.constant dense<2147483647> : vector<128xi32>
    %20 = vector.multi_reduction <minsi>, %19, %cst_10 [0] : vector<128x128xi32> to vector<128xi32>
    %21 = vector.shape_cast %20 : vector<128xi32> to vector<1x128xi32>
    %c0_11 = arith.constant 0 : index
    %22 = memref.load %arg2[%c0_11] : memref<1xi32, #tpu.memory_space<smem>>
    %c1_i32 = arith.constant 1 : i32
    %23 = arith.muli %arg0, %c1_i32 : i32
    %24 = arith.addi %23, %arg1 : i32
    %c128_i32_12 = arith.constant 128 : i32
    %25 = arith.muli %24, %c128_i32_12 : i32
    %26 = tpu.iota {dimensions = array<i32: 1>} : vector<1x128xi32>
    %27 = vector.broadcast %25 : i32 to vector<1x128xi32>
    %28 = arith.addi %27, %26 : vector<1x128xi32>
    %29 = vector.broadcast %22 : i32 to vector<1x128xi32>
    %30 = arith.cmpi slt, %28, %29 : vector<1x128xi32>
    %31 = vector.broadcast %21 : vector<1x128xi32> to vector<128x128xi32>
    %32 = arith.cmpi eq, %15, %31 : vector<128x128xi32>
    %33 = vector.broadcast %30 : vector<1x128xi1> to vector<128x128xi1>
    %34 = arith.andi %32, %33 : vector<128x128xi1>
    %35 = arith.extui %34 : vector<128x128xi1> to vector<128x128xi32>
    %36 = arith.sitofp %35 : vector<128x128xi32> to vector<128x128xf32>
    %37 = arith.truncf %36 : vector<128x128xf32> to vector<128x128xbf16>
    %cst_13 = arith.constant dense<0.000000e+00> : vector<128x128xf32>
    %38 = tpu.matmul %37, %5, %cst_13 {dimension_numbers = #tpu.dot_dimension_numbers<[0], [0], [1], [1], [0, 1, 1, 1], [], []>} : vector<128x128xbf16>, vector<128x128xbf16>, vector<128x128xf32> -> vector<128x128xf32>
    %cst_14 = arith.constant dense<0.000000e+00> : vector<128x128xf32>
    %39 = tpu.matmul %37, %6, %cst_14 {dimension_numbers = #tpu.dot_dimension_numbers<[0], [0], [1], [1], [0, 1, 1, 1], [], []>} : vector<128x128xbf16>, vector<128x128xbf16>, vector<128x128xf32> -> vector<128x128xf32>
    %40 = arith.addf %38, %39 : vector<128x128xf32>
    %cst_15 = arith.constant 1.000000e+00 : bf16
    %41 = vector.broadcast %cst_15 : bf16 to vector<1x128xbf16>
    %cst_16 = arith.constant dense<0.000000e+00> : vector<1x128xf32>
    %42 = tpu.matmul %41, %37, %cst_16 {dimension_numbers = #tpu.dot_dimension_numbers<[1], [1], [0], [0], [0, 0, 1, 0], [], []>} : vector<1x128xbf16>, vector<128x128xbf16>, vector<1x128xf32> -> vector<1x128xf32>
    %cst_17 = arith.constant dense<0.000000e+00> : vector<128x128xf32>
    %43 = tpu.matmul %37, %4, %cst_17 {dimension_numbers = #tpu.dot_dimension_numbers<[1], [0], [0], [1], [0, 0, 1, 1], [], []>} : vector<128x128xbf16>, vector<128x128xbf16>, vector<128x128xf32> -> vector<128x128xf32>
    %44 = arith.subf %40, %3 : vector<128x128xf32>
    %45 = arith.mulf %44, %44 : vector<128x128xf32>
    %cst_18 = arith.constant dense<0.000000e+00> : vector<128xf32>
    %46 = vector.multi_reduction <add>, %45, %cst_18 [1] : vector<128x128xf32> to vector<128xf32>
    %47 = vector.shape_cast %46 : vector<128xf32> to vector<128x1xf32>
    %cst_19 = arith.constant dense<0.000000e+00> : vector<1xf32>
    %48 = vector.multi_reduction <add>, %47, %cst_19 [0] : vector<128x1xf32> to vector<1xf32>
    %49 = vector.shape_cast %48 : vector<1xf32> to vector<1x1xf32>
    %c0_20 = arith.constant 0 : index
    %c0_21 = arith.constant 0 : index
    %50 = vector.load %arg7[%c0_20, %c0_21] : memref<128x128xf32, #tpu.memory_space<vmem>>, vector<128x128xf32>
    tpu.vector_store %arg7[%c0_20, %c0_21], %40 {strides = array<i32>} : memref<128x128xf32, #tpu.memory_space<vmem>>, vector<128x128xf32>,
    %c0_22 = arith.constant 0 : index
    %c0_23 = arith.constant 0 : index
    %51 = vector.load %arg8[%c0_22, %c0_23] : memref<1x128xi32, #tpu.memory_space<vmem>>, vector<1x128xi32>
    tpu.vector_store %arg8[%c0_22, %c0_23], %21 {strides = array<i32>} : memref<1x128xi32, #tpu.memory_space<vmem>>, vector<1x128xi32>,
    %c0_24 = arith.constant 0 : index
    %c0_25 = arith.constant 0 : index
    %c0_26 = arith.constant 0 : index
    %52 = vector.load %arg9[%c0_24, %c0_25, %c0_26] : memref<1x1x128xf32, #tpu.memory_space<vmem>>, vector<1x1x128xf32>
    %53 = vector.shape_cast %52 : vector<1x1x128xf32> to vector<1x128xf32>
    %54 = arith.addf %53, %42 : vector<1x128xf32>
    %c0_27 = arith.constant 0 : index
    %c0_28 = arith.constant 0 : index
    %c0_29 = arith.constant 0 : index
    %55 = vector.load %arg9[%c0_27, %c0_28, %c0_29] : memref<1x1x128xf32, #tpu.memory_space<vmem>>, vector<1x1x128xf32>
    %56 = vector.shape_cast %55 : vector<1x1x128xf32> to vector<1x128xf32>
    %57 = vector.shape_cast %54 : vector<1x128xf32> to vector<1x1x128xf32>
    tpu.vector_store %arg9[%c0_27, %c0_28, %c0_29], %57 {strides = array<i32>} : memref<1x1x128xf32, #tpu.memory_space<vmem>>, vector<1x1x128xf32>,
    %c0_30 = arith.constant 0 : index
    %c0_31 = arith.constant 0 : index
    %c0_32 = arith.constant 0 : index
    %58 = vector.load %arg10[%c0_30, %c0_31, %c0_32] : memref<1x128x128xf32, #tpu.memory_space<vmem>>, vector<1x128x128xf32>
    %59 = vector.shape_cast %58 : vector<1x128x128xf32> to vector<128x128xf32>
    %60 = arith.addf %59, %43 : vector<128x128xf32>
    %c0_33 = arith.constant 0 : index
    %c0_34 = arith.constant 0 : index
    %c0_35 = arith.constant 0 : index
    %61 = vector.load %arg10[%c0_33, %c0_34, %c0_35] : memref<1x128x128xf32, #tpu.memory_space<vmem>>, vector<1x128x128xf32>
    %62 = vector.shape_cast %61 : vector<1x128x128xf32> to vector<128x128xf32>
    %63 = vector.shape_cast %60 : vector<128x128xf32> to vector<1x128x128xf32>
    tpu.vector_store %arg10[%c0_33, %c0_34, %c0_35], %63 {strides = array<i32>} : memref<1x128x128xf32, #tpu.memory_space<vmem>>, vector<1x128x128xf32>,
    %c0_36 = arith.constant 0 : index
    %c0_37 = arith.constant 0 : index
    %c0_38 = arith.constant 0 : index
    %64 = vector.load %arg11[%c0_36, %c0_37, %c0_38] : memref<1x1x1xf32, #tpu.memory_space<vmem>>, vector<1x1x1xf32>
    %65 = vector.shape_cast %64 : vector<1x1x1xf32> to vector<1x1xf32>
    %66 = arith.addf %65, %49 : vector<1x1xf32>
    %c0_39 = arith.constant 0 : index
    %c0_40 = arith.constant 0 : index
    %c0_41 = arith.constant 0 : index
    %67 = vector.load %arg11[%c0_39, %c0_40, %c0_41] : memref<1x1x1xf32, #tpu.memory_space<vmem>>, vector<1x1x1xf32>
    %68 = vector.shape_cast %67 : vector<1x1x1xf32> to vector<1x1xf32>
    %69 = vector.shape_cast %66 : vector<1x1xf32> to vector<1x1x1xf32>
    tpu.vector_store %arg11[%c0_39, %c0_40, %c0_41], %69 {strides = array<i32>} : memref<1x1x1xf32, #tpu.memory_space<vmem>>, vector<1x1x1xf32>,
    return
  }
  func.func @transform_0(%arg0: i32, %arg1: i32, %arg2: memref<1xi32, #tpu.memory_space<smem>>) -> (i32, i32) {
    %c1_i32 = arith.constant 1 : i32
    %0 = arith.muli %arg0, %c1_i32 : i32
    %1 = arith.addi %0, %arg1 : i32
    %c0_i32 = arith.constant 0 : i32
    %c0_i32_0 = arith.constant 0 : i32
    return %1, %c0_i32 : i32, i32
  }
  func.func @transform_1(%arg0: i32, %arg1: i32, %arg2: memref<1xi32, #tpu.memory_space<smem>>) -> (i32, i32) {
    %c0_i32 = arith.constant 0 : i32
    %c0_i32_0 = arith.constant 0 : i32
    %c0_i32_1 = arith.constant 0 : i32
    return %c0_i32, %c0_i32_0 : i32, i32
  }
  func.func @transform_2(%arg0: i32, %arg1: i32, %arg2: memref<1xi32, #tpu.memory_space<smem>>) -> (i32, i32) {
    %c0_i32 = arith.constant 0 : i32
    %c0_i32_0 = arith.constant 0 : i32
    %c0_i32_1 = arith.constant 0 : i32
    return %c0_i32, %c0_i32_0 : i32, i32
  }
  func.func @transform_3(%arg0: i32, %arg1: i32, %arg2: memref<1xi32, #tpu.memory_space<smem>>) -> (i32, i32) {
    %c0_i32 = arith.constant 0 : i32
    %c0_i32_0 = arith.constant 0 : i32
    %c0_i32_1 = arith.constant 0 : i32
    return %c0_i32, %c0_i32_0 : i32, i32
  }
  func.func @transform_4(%arg0: i32, %arg1: i32, %arg2: memref<1xi32, #tpu.memory_space<smem>>) -> (i32, i32) {
    %c1_i32 = arith.constant 1 : i32
    %0 = arith.muli %arg0, %c1_i32 : i32
    %1 = arith.addi %0, %arg1 : i32
    %c0_i32 = arith.constant 0 : i32
    %c0_i32_0 = arith.constant 0 : i32
    return %1, %c0_i32 : i32, i32
  }
  func.func @transform_5(%arg0: i32, %arg1: i32, %arg2: memref<1xi32, #tpu.memory_space<smem>>) -> (i32, i32) {
    %c1_i32 = arith.constant 1 : i32
    %0 = arith.muli %arg0, %c1_i32 : i32
    %1 = arith.addi %0, %arg1 : i32
    %c0_i32 = arith.constant 0 : i32
    %c0_i32_0 = arith.constant 0 : i32
    return %c0_i32, %1 : i32, i32
  }
  func.func @transform_6(%arg0: i32, %arg1: i32, %arg2: memref<1xi32, #tpu.memory_space<smem>>) -> (i32, i32, i32) {
    %c0_i32 = arith.constant 0 : i32
    %c0_i32_0 = arith.constant 0 : i32
    %c0_i32_1 = arith.constant 0 : i32
    return %arg0, %c0_i32, %c0_i32_0 : i32, i32, i32
  }
  func.func @transform_7(%arg0: i32, %arg1: i32, %arg2: memref<1xi32, #tpu.memory_space<smem>>) -> (i32, i32, i32) {
    %c0_i32 = arith.constant 0 : i32
    %c0_i32_0 = arith.constant 0 : i32
    %c0_i32_1 = arith.constant 0 : i32
    return %arg0, %c0_i32, %c0_i32_0 : i32, i32, i32
  }
  func.func @transform_8(%arg0: i32, %arg1: i32, %arg2: memref<1xi32, #tpu.memory_space<smem>>) -> (i32, i32, i32) {
    %c0_i32 = arith.constant 0 : i32
    %c0_i32_0 = arith.constant 0 : i32
    %c0_i32_1 = arith.constant 0 : i32
    return %arg0, %c0_i32, %c0_i32_0 : i32, i32, i32
  }
}

</mosaic_0001>

<bundles_post_ra>
// kernel: squeeze.3
= control target key start
LH: loop header
LB: loop body
LE: loop exit
PB: predicated region body
PF: predicated region fallthrough
CT: control target
= control target key end

     0   :  { %s85_s0 = inlined_call_operand.vmem [shape: s32[16], index: 0, kind: input, shape index: {}]   ;;  %s86_s1 = inlined_call_operand.hbm [shape: s32[2,8], index: 1, kind: output, shape index: {}]  }
   0x1   :  { %v5_v0 = vld [vmem:[%s85_s0] sm:$0x1] }
   0x2   :  { %2 = vsyncpa [#allocation1], 0  ;;  %6 = vst [vmem:[#allocation3] sm:$0x1] %v5_v0  ;;  %vm8_vm0 = vcmask 64512   ;;  %s58_s0 = smov 120  }
   0x3   :  { %s59_s8 = smov [#allocation0]  }
   0x4   :  { %s26_s9 = sshll.u32 %s59_s8, 4  ;;  %s27_s9 = int_to_ptr.vmem [resolvable:$true] %s26_s9 }
   0x5   :  { %s34_s10 = scalar_lea.vmem %s27_s9, 32  ;;  %p39_p1 = scmp.lt.s32.totalorder %s27_s9, %s27_s9 }
   0x6   :  { %p35_p0 = scmp.ne.s32.totalorder %s27_s9, %s34_s10  ;;  %p40_p2 = scmp.lt.s32.totalorder %s34_s10, %s34_s10 }
   0x8   :  { %p41_p3 = por %p40_p2, %p39_p1 }
   0x9   :  { %v10_v1 = vld [vmem:[#allocation3] sm:$0x1]  }
   0xa   :  { %v7_v2 = vld [vmem:[#allocation3] sm:$0x1]   ;;  %11 = vrot.lane.b32.xlu0 %v10_v1, %s58_s0  ;;  %p42_p4 = pnand %p41_p3, %p35_p0 }
   0xb   :  { %9 = vst.msk [vmem:[#allocation2] sm:$0x1] %vm8_vm0, %v7_v2  }
  0x7c   :  { %v12_v3 = vpop.permute.xlu0 %11  }
  0x7d   :  { %15 = vst.msk [vmem:[#allocation2 + $0x1] sm:$0x1] %vm8_vm0, %v12_v3  }
  0x84   :  { %v19_v4 = vld [vmem:[#allocation2] sm:$0x3] }
  0x85   :  { %21 = vst [vmem:[#allocation0] sm:$0x3] %v19_v4 }
  0x86   :  { %45 = shalt.err (!%p42_p4)
}
  0x87   :  { %s46_s13 = scalar_lea.hbm %s86_s1, 32 }
  0x88   :  { %p47_p5 = scmp.ne.s32.totalorder %s86_s1, %s46_s13  ;;  %p50_p6 = scmp.lt.u32.totalorder %s46_s13, %s86_s1 }
  0x8a   :  { %p52_p7 = pnand %p50_p6, %p47_p5 }
  0x8c   :  { %55 = shalt.err (!%p52_p7)
}
  0x8d   :  { %29 = dma.vmem_to_hbm [thread:$0]  %s27_s9, 32, %s86_s1, [#allocation1]  }
  0x8e   :  { %56 = dma.done.wait [#allocation1], 32  }
  0x8f   :  { %57 = vsyncadd [#allocation1], 4294967264 }
  0x90   :  { %31 = vsyncpa [#allocation1], 1 }

// kernel: transformer_document_quantizer_forward.1
= control target key start
LH: loop header
LB: loop body
LE: loop exit
PB: predicated region body
PF: predicated region fallthrough
CT: control target
= control target key end

     0   :  { %v1589_v5 = vmov 0   ;;  %s2548_s0 = inlined_call_operand.<no memory space> [shape: s32[1], index: 0, kind: input, shape index: {}]   ;;  %s2549_s1 = inlined_call_operand.vmem [shape: f32[128,128], index: 1, kind: input, shape index: {}]   ;;  %s2550_s2 = inlined_call_operand.vmem [shape: bf16[128,128], index: 2, kind: input, shape index: {}]   ;;  %s2551_s3 = inlined_call_operand.vmem [shape: bf16[128,128], index: 3, kind: input, shape index: {}]   ;;  %s2552_s4 = inlined_call_operand.vmem [shape: f32[128,1], index: 4, kind: input, shape index: {}]   ;;  %s2553_s5 = inlined_call_operand.vmem [shape: f32[128,128], index: 5, kind: output, shape index: {0}]   ;;  %s2554_s6 = inlined_call_operand.vmem [shape: s32[1,128], index: 6, kind: output, shape index: {1}]   ;;  %s2555_s7 = inlined_call_operand.vmem [shape: f32[1,1,128], index: 7, kind: output, shape index: {2}]   ;;  %s2556_s8 = inlined_call_operand.vmem [shape: f32[1,128,128], index: 8, kind: output, shape index: {3}]   ;;  %s2557_s9 = inlined_call_operand.hbm [shape: f32[1,1,1], index: 9, kind: output, shape index: {4}]  }
   0x1   :  { %v1648_v0 = vld [vmem:[%s2549_s1] sm:$0xff]  ;;  %v1653_v1 = vld [vmem:[%s2549_s1 + $0x8] sm:$0xff]  ;;  %v1658_v2 = vld [vmem:[%s2549_s1 + $0x10] sm:$0xff]  ;;  %1547 = vset.pattern.permute.xlu1 %v1589_v5  ;;  %1546 = vset.pattern.permute.xlu0 %v1589_v5 }
   0x2   :  { %v1662_v3 = vpack.c.bf16 %v1653_v1, %v1648_v0  ;;  %v1667_v4 = vld [vmem:[%s2549_s1 + $0x18] sm:$0xff]  ;;  %v1678_v7 = vld [vmem:[%s2549_s1 + $0x20] sm:$0xff]  ;;  %v100_v8 = vld [vmem:[%s2549_s1 + $0x28] sm:$0xff] }
   0x3   :  { %v1671_v6 = vpack.c.bf16 %v1667_v4, %v1658_v2  ;;  %2587 = vst [vmem:[#allocation7_spill] sm:$0xff] %v1678_v7  ;;  %v1687_v9 = vld [vmem:[%s2550_s2] sm:$0xff]   ;;  %v1691_v10 = vpack.c.bf16 %v100_v8, %v1678_v7  ;;  %v153_v11 = vld [vmem:[%s2552_s4 + $0x10] sm:$0xff]  ;;  %v1709_v14 = vld [vmem:[%s2549_s1 + $0x38] sm:$0xff] }
   0x4   :  { %1376 = vmatprep.subr.bf16.mxu0 %v1662_v3  ;;  %1392 = vmatprep.mubr.bf16.mxu0 %v1687_v9  ;;  %v151_v12 = vld [vmem:[%s2552_s4] sm:$0xff]  ;;  %v1704_v13 = vld [vmem:[%s2549_s1 + $0x30] sm:$0xff]  ;;  %2589 = vst [vmem:[#allocation9_spill] sm:$0xff] %v1709_v14  ;;  %v154_v15 = vld [vmem:[%s2552_s4 + $0x18] sm:$0xff] }
   0x5   :  { %1377 = vmatpush3.bf16.xpose.msra.mxu0 %v1662_v3  ;;  %2588 = vst [vmem:[#allocation8_spill] sm:$0xff] %v1704_v13  ;;  %340 = vperm.xlu1 %1547, %v153_v11   ;;  %v152_v16 = vld [vmem:[%s2552_s4 + $0x8] sm:$0xff]  ;;  %v1719_v17 = vpack.c.bf16 %v1709_v14, %v1704_v13  ;;  %v155_v19 = vld [vmem:[%s2552_s4 + $0x20] sm:$0xff]  ;;  %v158_v22 = vld [vmem:[%s2552_s4 + $0x38] sm:$0xff] }
   0x6   :  { %1378 = vmatprep.subr.bf16.mxu0 %v1671_v6  ;;  %330 = vperm.xlu0 %1546, %v151_v12   ;;  %v156_v18 = vld [vmem:[%s2552_s4 + $0x28] sm:$0xff]  ;;  %v1731_v20 = vld [vmem:[%s2549_s1 + $0x40] sm:$0xff]  ;;  %v157_v23 = vld [vmem:[%s2552_s4 + $0x30] sm:$0xff] }
   0x7   :  { %2590 = vst [vmem:[#allocation10_spill] sm:$0xff] %v1731_v20  ;;  %v1736_v21 = vld [vmem:[%s2549_s1 + $0x48] sm:$0xff] }
   0x8   :  { %2591 = vst [vmem:[#allocation11_spill] sm:$0xff] %v1736_v21 }
   0x9   :  { %345 = vperm.xlu1 %1547, %v154_v15  }
   0xa   :  { %335 = vperm.xlu0 %1546, %v152_v16  }
   0xd   :  { %1379 = vmatpush3.bf16.xpose.msra.mxu0 %v1671_v6  ;;  %355 = vperm.xlu1 %1547, %v156_v18  }
   0xe   :  { %1380 = vmatprep.subr.bf16.mxu0 %v1691_v10  ;;  %350 = vperm.xlu0 %1546, %v155_v19  }
  0x15   :  { %1381 = vmatpush3.bf16.xpose.msra.mxu0 %v1691_v10 }
  0x16   :  { %1382 = vmatprep.subr.bf16.mxu0 %v1719_v17 }
  0x17   :  { %16 = vsyncpa [#allocation5], 0  ;;  %v1747_v24 = vpack.c.bf16 %v1736_v21, %v1731_v20  ;;  %365 = vperm.xlu1 %1547, %v158_v22   ;;  %360 = vperm.xlu0 %1546, %v157_v23   ;;  %v160_v25 = vld [vmem:[%s2552_s4 + $0x48] sm:$0xff]  ;;  %v159_v26 = vld [vmem:[%s2552_s4 + $0x40] sm:$0xff]  ;;  %v2558_v49 = vmov 0.0  }
  0x18   :  { %v1760_v27 = vld [vmem:[%s2549_s1 + $0x50] sm:$0xff]  ;;  %v1765_v28 = vld [vmem:[%s2549_s1 + $0x58] sm:$0xff]  ;;  %v164_v32 = vld [vmem:[%s2552_s4 + $0x68] sm:$0xff]  ;;  %76 = vst [vmem:[%s2555_s7] sm:$0x1] %v2558_v49 }
  0x19   :  { %2592 = vst [vmem:[#allocation12_spill] sm:$0xff] %v1760_v27  ;;  %2593 = vst [vmem:[#allocation13_spill] sm:$0xff] %v1765_v28  ;;  %v162_v29 = vld [vmem:[%s2552_s4 + $0x58] sm:$0xff]  ;;  %v161_v30 = vld [vmem:[%s2552_s4 + $0x50] sm:$0xff]  ;;  %v1775_v31 = vpack.c.bf16 %v1765_v28, %v1760_v27 }
  0x1a   :  { %v163_v33 = vld [vmem:[%s2552_s4 + $0x60] sm:$0xff]  ;;  %v1793_v35 = vld [vmem:[%s2549_s1 + $0x68] sm:$0xff]  ;;  %v166_v36 = vld [vmem:[%s2552_s4 + $0x78] sm:$0xff] }
  0x1b   :  { %375 = vperm.xlu1 %1547, %v160_v25   ;;  %370 = vperm.xlu0 %1546, %v159_v26   ;;  %v1788_v34 = vld [vmem:[%s2549_s1 + $0x60] sm:$0xff]  ;;  %2595 = vst [vmem:[#allocation15_spill] sm:$0xff] %v1793_v35  ;;  %v165_v37 = vld [vmem:[%s2552_s4 + $0x70] sm:$0xff]  ;;  %v1815_v40 = vld [vmem:[%s2549_s1 + $0x78] sm:$0xff] }
  0x1c   :  { %2594 = vst [vmem:[#allocation14_spill] sm:$0xff] %v1788_v34  ;;  %v1803_v38 = vpack.c.bf16 %v1793_v35, %v1788_v34  ;;  %v1810_v39 = vld [vmem:[%s2549_s1 + $0x70] sm:$0xff]  ;;  %2597 = vst [vmem:[#allocation17_spill] sm:$0xff] %v1815_v40  ;;  %v1827_v42 = vld [vmem:[%s2550_s2 + $0x8] sm:$0xff]  }
  0x1d   :  { %1383 = vmatpush3.bf16.xpose.msra.mxu0 %v1719_v17  ;;  %2596 = vst [vmem:[#allocation16_spill] sm:$0xff] %v1810_v39  ;;  %v1819_v41 = vpack.c.bf16 %v1815_v40, %v1810_v39  ;;  %v1832_v43 = vld [vmem:[%s2550_s2 + $0x10] sm:$0xff]   ;;  %v1839_v44 = vld [vmem:[%s2550_s2 + $0x18] sm:$0xff]   ;;  %v1844_v45 = vld [vmem:[%s2550_s2 + $0x20] sm:$0xff]  }
  0x1e   :  { %1384 = vmatprep.subr.bf16.mxu0 %v1747_v24  ;;  %v1851_v46 = vld [vmem:[%s2550_s2 + $0x28] sm:$0xff]   ;;  %v1856_v47 = vld [vmem:[%s2550_s2 + $0x30] sm:$0xff]   ;;  %v1863_v48 = vld [vmem:[%s2550_s2 + $0x38] sm:$0xff]  }
  0x1f   :  { %385 = vperm.xlu1 %1547, %v162_v29   ;;  %380 = vperm.xlu0 %1546, %v161_v30  }
  0x23   :  { %395 = vperm.xlu1 %1547, %v164_v32   ;;  %390 = vperm.xlu0 %1546, %v163_v33  }
  0x25   :  { %1385 = vmatpush3.bf16.xpose.msra.mxu0 %v1747_v24 }
  0x26   :  { %1386 = vmatprep.subr.bf16.mxu0 %v1775_v31 }
  0x27   :  { %405 = vperm.xlu1 %1547, %v166_v36   ;;  %400 = vperm.xlu0 %1546, %v165_v37   ;;  %v1556_v36 = vld [vmem:[%s2551_s3] sm:$0xff]   ;;  %v1557_v37 = vld [vmem:[%s2551_s3 + $0x8] sm:$0xff]  }
  0x28   :  { %1408 = vmatprep.subr.bf16.mxu1 %v1556_v36 }
  0x29   :  { %1409 = vmatpush3.bf16.msra.mxu1 %v1556_v36 }
  0x2a   :  { %1410 = vmatprep.subr.bf16.mxu1 %v1557_v37 }
  0x2d   :  { %1387 = vmatpush3.bf16.xpose.msra.mxu0 %v1775_v31  ;;  %1411 = vmatpush3.bf16.msra.mxu1 %v1557_v37 }
  0x2e   :  { %1388 = vmatprep.subr.bf16.mxu0 %v1803_v38 }
  0x35   :  { %1389 = vmatpush3.bf16.xpose.msra.mxu0 %v1803_v38 }
  0x36   :  { %1390 = vmatprep.subr.bf16.mxu0 %v1819_v41 }
  0x3d   :  { %1391 = vmatpush3.bf16.xpose.msra.mxu0 %v1819_v41 }
  0x3e   :  { %1472 = vmatprep.subr.bf16.mxu0 %v2558_v49 }
  0x44   :  { %1393 = vmatmul.mubr.bf16.vlgmr.msra.gmra.mrb[0].mxu0 %v1827_v42 }
  0x45   :  { %1396 = vmatprep.mubr.bf16.mxu0 %v1832_v43 }
  0x4c   :  { %1397 = vmatmul.mubr.bf16.gmra.mrb[4].mxu0 %v1839_v44 }
  0x4d   :  { %1400 = vmatprep.mubr.bf16.mxu0 %v1844_v45 }
  0x54   :  { %1401 = vmatmul.mubr.bf16.gmra.mrb[8].mxu0 %v1851_v46 }
  0x55   :  { %1404 = vmatprep.mubr.bf16.mxu0 %v1856_v47 }
  0x5c   :  { %1405 = vmatmul.mubr.bf16.gmra.mrb[12].mxu0 %v1863_v48 }
  0x84   :  { %v341_v51 = vpop.permute.xlu1 %340 }
  0x85   :  { %v331_v50 = vpop.permute.xlu0 %330 }
  0x88   :  { %v346_v53 = vpop.permute.xlu1 %345 }
  0x89   :  { %v336_v52 = vpop.permute.xlu0 %335 }
  0x8c   :  { %v356_v55 = vpop.permute.xlu1 %355 }
  0x8d   :  { %v351_v54 = vpop.permute.xlu0 %350 }
  0x96   :  { %v361_v58 = vpop.permute.xlu0 %360  ;;  %v366_v61 = vpop.permute.xlu1 %365 }
  0x9a   :  { %v371_v63 = vpop.permute.xlu0 %370  ;;  %v376_v16 = vpop.permute.xlu1 %375 }
 0x117   :  { %v1394_v56 = vpop.f32.mrb[0].mxu0 }
 0x118   :  { %v249_v57 = vpop.f32.mrb[1].mxu0  ;;  %v314_v62 = vmul.f32 2.0, %v1394_v56 }
 0x119   :  { %v1395_v59 = vpop.f32.mrb[2].mxu0  ;;  %v312_v5 = vmul.f32 2.0, %v249_v57 }
 0x11a   :  { %v252_v60 = vpop.f32.mrb[3].mxu0  ;;  %v315_v11 = vmul.f32 2.0, %v1395_v59  ;;  %v1871_v23 = vsub.f32 %v341_v51, %v314_v62 }
 0x11b   :  { %v313_v18 = vmul.f32 2.0, %v252_v60  ;;  %v1875_v30 = vsub.f32 %v331_v50, %v312_v5  ;;  %v381_v50 = vpop.permute.xlu0 %380 }
 0x11c   :  { %v1885_v56 = vsub.f32 %v346_v53, %v315_v11  ;;  %v386_v53 = vpop.permute.xlu1 %385 }
 0x11f   :  { %v1398_v8 = vpop.f32.mrb[4].mxu0 }
 0x120   :  { %v318_v12 = vmul.f32 2.0, %v1398_v8  ;;  %v265_v15 = vpop.f32.mrb[5].mxu0 }
 0x121   :  { %v316_v19 = vmul.f32 2.0, %v265_v15  ;;  %v1399_v22 = vpop.f32.mrb[6].mxu0 }
 0x122   :  { %v1873_v25 = vsub.f32 %v361_v58, %v318_v12  ;;  %v319_v26 = vmul.f32 2.0, %v1399_v22  ;;  %v268_v29 = vpop.f32.mrb[7].mxu0  ;;  %v1891_v58 = vsub.f32 %v336_v52, %v313_v18  ;;  %v1558_v52 = vld [vmem:[%s2551_s3 + $0x10] sm:$0xff]  }
 0x123   :  { %v1877_v32 = vsub.f32 %v351_v54, %v316_v19  ;;  %v317_v33 = vmul.f32 2.0, %v268_v29  ;;  %v391_v19 = vpop.permute.xlu0 %390  ;;  %1412 = vmatprep.subr.bf16.mxu1 %v1558_v52  ;;  %v1559_v29 = vld [vmem:[%s2551_s3 + $0x18] sm:$0xff]  }
 0x124   :  { %v426_v51 = vmin.f32 %v1871_v23, %v1873_v25  ;;  %v1889_v57 = vsub.f32 %v366_v61, %v319_v26  ;;  %1413 = vmatpush3.bf16.msra.mxu1 %v1558_v52 }
 0x125   :  { %v424_v54 = vmin.f32 %v1875_v30, %v1877_v32  ;;  %v1895_v59 = vsub.f32 %v356_v55, %v317_v33  ;;  %1414 = vmatprep.subr.bf16.mxu1 %v1559_v29 }
 0x126   :  { %v427_v60 = vmin.f32 %v1885_v56, %v1889_v57 }
 0x127   :  { %v425_v62 = vmin.f32 %v1891_v58, %v1895_v59  ;;  %v1402_v5 = vpop.f32.mrb[8].mxu0 }
 0x128   :  { %v322_v61 = vmul.f32 2.0, %v1402_v5  ;;  %v281_v8 = vpop.f32.mrb[9].mxu0  ;;  %v396_v5 = vpop.permute.xlu1 %395  ;;  %1415 = vmatpush3.bf16.msra.mxu1 %v1559_v29  ;;  %v1562_v29 = vld [vmem:[%s2551_s3 + $0x30] sm:$0xff]  }
 0x129   :  { %v320_v11 = vmul.f32 2.0, %v281_v8  ;;  %v1403_v55 = vpop.f32.mrb[10].mxu0 }
 0x12a   :  { %v1904_v12 = vsub.f32 %v381_v50, %v322_v61  ;;  %v323_v15 = vmul.f32 2.0, %v1403_v55  ;;  %v284_v18 = vpop.f32.mrb[11].mxu0 }
 0x12b   :  { %v1906_v22 = vsub.f32 %v371_v63, %v320_v11  ;;  %v321_v26 = vmul.f32 2.0, %v284_v18  ;;  %v1560_v11 = vld [vmem:[%s2551_s3 + $0x20] sm:$0xff]  }
 0x12c   :  { %v430_v33 = vmin.f32 %v426_v51, %v1904_v12  ;;  %v1912_v36 = vsub.f32 %v386_v53, %v323_v15  ;;  %v401_v53 = vpop.permute.xlu0 %400  ;;  %1416 = vmatprep.subr.bf16.mxu1 %v1560_v11 }
 0x12d   :  { %v428_v50 = vmin.f32 %v424_v54, %v1906_v22  ;;  %v1915_v61 = vsub.f32 %v376_v16, %v321_v26  ;;  %v1561_v26 = vld [vmem:[%s2551_s3 + $0x28] sm:$0xff]   ;;  %1417 = vmatpush3.bf16.msra.mxu1 %v1560_v11 }
 0x12e   :  { %v431_v37 = vmin.f32 %v427_v60, %v1912_v36  ;;  %v406_v60 = vpop.permute.xlu1 %405  ;;  %1418 = vmatprep.subr.bf16.mxu1 %v1561_v26 }
 0x12f   :  { %v429_v63 = vmin.f32 %v425_v62, %v1915_v61  ;;  %v1406_v8 = vpop.f32.mrb[12].mxu0 }
 0x130   :  { %v326_v55 = vmul.f32 2.0, %v1406_v8  ;;  %v297_v51 = vpop.f32.mrb[13].mxu0 }
 0x131   :  { %v324_v15 = vmul.f32 2.0, %v297_v51  ;;  %v1407_v18 = vpop.f32.mrb[14].mxu0  ;;  %1419 = vmatpush3.bf16.msra.mxu1 %v1561_v26 }
 0x132   :  { %v1922_v49 = vsub.f32 %v401_v53, %v326_v55  ;;  %v327_v16 = vmul.f32 2.0, %v1407_v18  ;;  %v300_v54 = vpop.f32.mrb[15].mxu0  ;;  %1420 = vmatprep.subr.bf16.mxu1 %v1562_v29 }
 0x133   :  { %v1924_v52 = vsub.f32 %v391_v19, %v324_v15  ;;  %v325_v62 = vmul.f32 2.0, %v300_v54 }
 0x134   :  { %v434_v8 = vmin.f32 %v430_v33, %v1922_v49  ;;  %v1930_v39 = vsub.f32 %v406_v60, %v327_v16 }
 0x135   :  { %v432_v51 = vmin.f32 %v428_v50, %v1924_v52  ;;  %v1933_v55 = vsub.f32 %v396_v5, %v325_v62  ;;  %v1563_v5 = vld [vmem:[%s2551_s3 + $0x38] sm:$0xff]   ;;  %v2561_v50 = vlaneseq  ;;  %1421 = vmatpush3.bf16.msra.mxu1 %v1562_v29 }
 0x136   :  { %v435_v53 = vmin.f32 %v431_v37, %v1930_v39  ;;  %1422 = vmatprep.subr.bf16.mxu1 %v1563_v5 }
 0x137   :  { %v433_v19 = vmin.f32 %v429_v63, %v1933_v55  ;;  %v1944_v63 = vshrl.u32 %v2561_v50, 7 }
 0x138   :  { %v437_v15 = vmin.f32 %v434_v8, %v435_v53 }
 0x139   :  { %v436_v18 = vmin.f32 %v432_v51, %v433_v19  ;;  %1423 = vmatpush3.bf16.msra.mxu1 %v1563_v5  ;;  %v1948_v60 = vadd.s32 8, %v1944_v63  ;;  %v1951_v26 = vadd.s32 16, %v1944_v63  ;;  %v1954_v8 = vadd.s32 24, %v1944_v63 }
 0x13a   :  { %1440 = vmatprep.subr.bf16.mxu1 %v1687_v9  ;;  %v1957_v51 = vadd.s32 32, %v1944_v63  ;;  %v1960_v53 = vadd.s32 40, %v1944_v63  ;;  %v1963_v19 = vadd.s32 48, %v1944_v63  ;;  %v1966_v29 = vadd.s32 56, %v1944_v63 }
 0x13b   :  { %v438_v33 = vmin.f32 %v436_v18, %v437_v15  ;;  %v1969_v15 = vadd.s32 64, %v1944_v63  ;;  %v1975_v5 = vadd.s32 80, %v1944_v63  ;;  %v1987_v50 = vadd.s32 112, %v1944_v63 }
 0x13d   :  { %v439_v16 = vrot.slane %v438_v33, 4 }
 0x13f   :  { %v440_v37 = vmin.f32 %v438_v33, %v439_v16  ;;  %v1972_v33 = vadd.s32 72, %v1944_v63  ;;  %v1978_v16 = vadd.s32 88, %v1944_v63 }
 0x141   :  { %v441_v11 = vrot.slane %v440_v37, 2 }
 0x143   :  { %v442_v54 = vmin.f32 %v440_v37, %v441_v11  ;;  %v1981_v37 = vadd.s32 96, %v1944_v63  ;;  %v1984_v11 = vadd.s32 104, %v1944_v63 }
 0x145   :  { %v443_v62 = vrot.slane %v442_v54, 1 }
 0x147   :  { %v444_v18 = vmin.f32 %v442_v54, %v443_v62  ;;  %v1990_v54 = vadd.s32 120, %v1944_v63 }
 0x149   :  { %vm462_vm0 = vcmp.eq.f32.partialorder %v1875_v30, %v444_v18  ;;  %vm463_vm1 = vcmp.eq.f32.partialorder %v1891_v58, %v444_v18  ;;  %vm464_vm2 = vcmp.eq.f32.partialorder %v1871_v23, %v444_v18  ;;  %vm465_vm3 = vcmp.eq.f32.partialorder %v1885_v56, %v444_v18 }
 0x14a   :  { %vm466_vm4 = vcmp.eq.f32.partialorder %v1877_v32, %v444_v18  ;;  %vm467_vm5 = vcmp.eq.f32.partialorder %v1895_v59, %v444_v18  ;;  %vm468_vm6 = vcmp.eq.f32.partialorder %v1873_v25, %v444_v18  ;;  %vm469_vm7 = vcmp.eq.f32.partialorder %v1889_v57, %v444_v18 }
 0x14b   :  { %vm470_vm8 = vcmp.eq.f32.partialorder %v1906_v22, %v444_v18  ;;  %vm471_vm9 = vcmp.eq.f32.partialorder %v1915_v61, %v444_v18  ;;  %vm472_vm10 = vcmp.eq.f32.partialorder %v1904_v12, %v444_v18  ;;  %vm473_vm11 = vcmp.eq.f32.partialorder %v1912_v36, %v444_v18 }
 0x14c   :  { %vm474_vm12 = vcmp.eq.f32.partialorder %v1924_v52, %v444_v18  ;;  %vm475_vm13 = vcmp.eq.f32.partialorder %v1933_v55, %v444_v18  ;;  %vm476_vm14 = vcmp.eq.f32.partialorder %v1922_v49, %v444_v18  ;;  %vm477_vm15 = vcmp.eq.f32.partialorder %v1930_v39, %v444_v18 }
 0x14d   :  { %v478_v62 = vsel %vm462_vm0, %v1944_v63, 128  ;;  %v479_v34 = vsel %vm463_vm1, %v1948_v60, 128  ;;  %v480_v27 = vsel %vm464_vm2, %v1951_v26, 128  ;;  %v481_v21 = vsel %vm465_vm3, %v1954_v8, 128 }
 0x14e   :  { %v482_v40 = vsel %vm466_vm4, %v1957_v51, 128  ;;  %v483_v30 = vsel %vm467_vm5, %v1960_v53, 128  ;;  %v484_v58 = vsel %vm468_vm6, %v1963_v19, 128  ;;  %v485_v23 = vsel %vm469_vm7, %v1966_v29, 128 }
 0x14f   :  { %v486_v56 = vsel %vm470_vm8, %v1969_v15, 128  ;;  %v487_v32 = vsel %vm471_vm9, %v1972_v33, 128  ;;  %v488_v59 = vsel %vm472_vm10, %v1975_v5, 128  ;;  %v489_v25 = vsel %vm473_vm11, %v1978_v16, 128 }
 0x150   :  { %v490_v57 = vsel %vm474_vm12, %v1981_v37, 128  ;;  %v491_v22 = vsel %vm475_vm13, %v1984_v11, 128  ;;  %v492_v61 = vsel %vm476_vm14, %v1987_v50, 128  ;;  %v493_v12 = vsel %vm477_vm15, %v1990_v54, 128 }
 0x151   :  { %vm494_vm0 = vcmp.lt.s32.totalorder %v478_v62, %v482_v40  ;;  %vm496_vm1 = vcmp.lt.s32.totalorder %v479_v34, %v483_v30  ;;  %vm498_vm2 = vcmp.lt.s32.totalorder %v480_v27, %v484_v58  ;;  %vm500_vm3 = vcmp.lt.s32.totalorder %v481_v21, %v485_v23 }
 0x152   :  { %v495_v36 = vsel %vm494_vm0, %v478_v62, %v482_v40  ;;  %v497_v35 = vsel %vm496_vm1, %v479_v34, %v483_v30  ;;  %v499_v52 = vsel %vm498_vm2, %v480_v27, %v484_v58  ;;  %v501_v20 = vsel %vm500_vm3, %v481_v21, %v485_v23 }
 0x153   :  { %vm502_vm4 = vcmp.lt.s32.totalorder %v495_v36, %v486_v56  ;;  %vm504_vm5 = vcmp.lt.s32.totalorder %v497_v35, %v487_v32  ;;  %vm506_vm6 = vcmp.lt.s32.totalorder %v499_v52, %v488_v59  ;;  %vm508_vm7 = vcmp.lt.s32.totalorder %v501_v20, %v489_v25 }
 0x154   :  { %v503_v55 = vsel %vm502_vm4, %v495_v36, %v486_v56  ;;  %v505_v28 = vsel %vm504_vm5, %v497_v35, %v487_v32  ;;  %v507_v49 = vsel %vm506_vm6, %v499_v52, %v488_v59  ;;  %v509_v7 = vsel %vm508_vm7, %v501_v20, %v489_v25 }
 0x155   :  { %vm510_vm8 = vcmp.lt.s32.totalorder %v503_v55, %v490_v57  ;;  %vm512_vm9 = vcmp.lt.s32.totalorder %v505_v28, %v491_v22  ;;  %vm514_vm10 = vcmp.lt.s32.totalorder %v507_v49, %v492_v61  ;;  %vm516_vm11 = vcmp.lt.s32.totalorder %v509_v7, %v493_v12 }
 0x156   :  { %v511_v39 = vsel %vm510_vm8, %v503_v55, %v490_v57  ;;  %v513_v18 = vsel %vm512_vm9, %v505_v28, %v491_v22  ;;  %v515_v13 = vsel %vm514_vm10, %v507_v49, %v492_v61  ;;  %v517_v14 = vsel %vm516_vm11, %v509_v7, %v493_v12 }
 0x157   :  { %vm518_vm12 = vcmp.lt.s32.totalorder %v511_v39, %v513_v18  ;;  %vm520_vm13 = vcmp.lt.s32.totalorder %v515_v13, %v517_v14  ;;  %v2598_v20 = vlaneseq  ;;  %v540_v28 = vstv %s2548_s0 }
 0x158   :  { %v519_v27 = vsel %vm518_vm12, %v511_v39, %v513_v18  ;;  %v521_v21 = vsel %vm520_vm13, %v515_v13, %v517_v14  ;;  %v2605_v32 = vmov 0.0   ;;  %v2608_v25 = vmov 0 }
 0x159   :  { %vm522_vm14 = vcmp.lt.s32.totalorder %v519_v27, %v521_v21  ;;  %v537_v30 = vand.u32 127, %v2598_v20  ;;  %v2610_v22 = vmov 0  ;;  %v1593_v7 = vmov 1065369472  }
 0x15a   :  { %v523_v34 = vsel %vm522_vm14, %v519_v27, %v521_v21 }
 0x15b   :  { %v524_v40 = vrot.slane %v523_v34, 4  ;;  %vm2060_vm2 = vcmp.lt.s32.totalorder %v537_v30, %v540_v28  ;;  %v2630_v30 = vmov 0 }
 0x15d   :  { %vm525_vm15 = vcmp.lt.s32.totalorder %v523_v34, %v524_v40 }
 0x15e   :  { %v526_v62 = vsel %vm525_vm15, %v523_v34, %v524_v40  ;;  %v2626_v34 = vmov 0 }
 0x15f   :  { %v527_v35 = vrot.slane %v526_v62, 2 }
 0x161   :  { %vm528_vm0 = vcmp.lt.s32.totalorder %v526_v62, %v527_v35 }
 0x162   :  { %v529_v58 = vsel %vm528_vm0, %v526_v62, %v527_v35 }
 0x163   :  { %v530_v23 = vrot.slane %v529_v58, 1 }
 0x165   :  { %vm531_vm1 = vcmp.lt.s32.totalorder %v529_v58, %v530_v23 }
 0x166   :  { %v2064_v13 = vsel %vm531_vm1, %v529_v58, %v530_v23 }
 0x167   :  { %1112 = vst [vmem:[%s2554_s6] sm:$0x1] %v2064_v13  ;;  %vm542_vm3 = vcmp.eq.s32.totalorder %v1944_v63, %v2064_v13  ;;  %vm543_vm4 = vcmp.eq.s32.totalorder %v1948_v60, %v2064_v13  ;;  %vm544_vm6 = vcmp.eq.s32.totalorder %v1951_v26, %v2064_v13  ;;  %vm545_vm8 = vcmp.eq.s32.totalorder %v1954_v8, %v2064_v13 }
 0x168   :  { %vm2076_vm5 = vmand %vm542_vm3, %vm2060_vm2  ;;  %v1591_v26 = vmov 1.0|1.0   ;;  %v2606_v8 = vmov 0  ;;  %vm546_vm11 = vcmp.eq.s32.totalorder %v1957_v51, %v2064_v13  ;;  %vm547_vm13 = vcmp.eq.s32.totalorder %v1960_v53, %v2064_v13 }
 0x169   :  { %vm2084_vm7 = vmand %vm543_vm4, %vm2060_vm2  ;;  %v1247_v63 = vsel %vm2076_vm5, 1.0, %v2605_v32  ;;  %vm548_vm14 = vcmp.eq.s32.totalorder %v1963_v19, %v2064_v13  ;;  %vm549_vm0 = vcmp.eq.s32.totalorder %v1966_v29, %v2064_v13  ;;  %v2612_v53 = vmov 0 }
 0x16a   :  { %vm2573_vm9 = vmpackc.low %vm2084_vm7, %vm2076_vm5  ;;  %v1248_v60 = vsel %vm2084_vm7, 1.0, %v2605_v32 }
 0x16b   :  { %1473 = vmatpush3.bf16.xpose.msk.msra.mxu0 %vm2573_vm9, %v1591_v26  ;;  %v608_v59 = vpack.c.bf16 %v1248_v60, %v1247_v63  ;;  %vm2108_vm10 = vmand %vm544_vm6, %vm2060_vm2  ;;  %vm550_vm6 = vcmp.eq.s32.totalorder %v1969_v15, %v2064_v13  ;;  %vm554_vm9 = vcmp.eq.s32.totalorder %v1981_v37, %v2064_v13 }
 0x16c   :  { %v2607_v8 = vsel %vm2108_vm10, 4294967295, %v2606_v8  ;;  %vm2116_vm12 = vmand %vm545_vm8, %vm2060_vm2  ;;  %v1249_v57 = vsel %vm2108_vm10, 1.0, %v2605_v32  ;;  %1474 = vmatprep.subr.bf16.mxu0 %v2605_v32 }
 0x16d   :  { %v2609_v25 = vsel %vm2116_vm12, 4294967295, %v2608_v25  ;;  %616 = vxpose.xlu0.c.b16.start [1/8] %v608_v59, 128  ;;  %v1250_v51 = vsel %vm2116_vm12, 1.0, %v2605_v32  ;;  %vm2133_vm15 = vmand %vm546_vm11, %vm2060_vm2  ;;  %vm551_vm11 = vcmp.eq.s32.totalorder %v1972_v33, %v2064_v13 }
 0x16e   :  { %v2611_v22 = vsel %vm2133_vm15, 4294967295, %v2610_v22  ;;  %v609_v61 = vpack.c.bf16 %v1250_v51, %v1249_v57  ;;  %vm2141_vm1 = vmand %vm547_vm13, %vm2060_vm2  ;;  %v1251_v19 = vsel %vm2133_vm15, 1.0, %v2605_v32 }
 0x16f   :  { %v2613_v53 = vsel %vm2141_vm1, 4294967295, %v2612_v53  ;;  %v1252_v12 = vsel %vm2141_vm1, 1.0, %v2605_v32  ;;  %vm2153_vm3 = vmand %vm548_vm14, %vm2060_vm2 }
 0x170   :  { %vm2159_vm4 = vmand %vm549_vm0, %vm2060_vm2  ;;  %v610_v52 = vpack.c.bf16 %v1252_v12, %v1251_v19  ;;  %v1253_v15 = vsel %vm2153_vm3, 1.0, %v2605_v32  ;;  %vm552_vm0 = vcmp.eq.s32.totalorder %v1975_v5, %v2064_v13  ;;  %v2652_v19 = vld [vmem:[#allocation13_spill] sm:$0xff] }
 0x171   :  { %617 = vxpose.xlu0.c.b16.cont [2/8] %v609_v61, 128  ;;  %vm2572_vm8 = vmpackc.low %vm2116_vm12, %vm2108_vm10  ;;  %v1254_v55 = vsel %vm2159_vm4, 1.0, %v2605_v32  ;;  %vm555_vm10 = vcmp.eq.s32.totalorder %v1984_v11, %v2064_v13  ;;  %v2651_v61 = vld [vmem:[#allocation7_spill] sm:$0xff] }
 0x172   :  { %vm2186_vm13 = vmand %vm550_vm6, %vm2060_vm2  ;;  %v611_v39 = vpack.c.bf16 %v1254_v55, %v1253_v15  ;;  %v1564_v15 = vld [vmem:[%s2549_s1 + $0x28] sm:$0xff] }
 0x173   :  { %1475 = vmatpush3.bf16.xpose.msk.msra.mxu0 %vm2572_vm8, %v1591_v26  ;;  %vm2192_vm14 = vmand %vm551_vm11, %vm2060_vm2  ;;  %vm553_vm8 = vcmp.eq.s32.totalorder %v1978_v16, %v2064_v13  ;;  %v1255_v18 = vsel %vm2186_vm13, 1.0, %v2605_v32 }
 0x174   :  { %1476 = vmatprep.subr.bf16.mxu0 %v2605_v32  ;;  %v1256_v27 = vsel %vm2192_vm14, 1.0, %v2605_v32  ;;  %vm2208_vm6 = vmand %vm552_vm0, %vm2060_vm2 }
 0x175   :  { %618 = vxpose.xlu0.c.b16.cont [3/8] %v610_v52, 128  ;;  %vm2214_vm11 = vmand %vm553_vm8, %vm2060_vm2  ;;  %v612_v16 = vpack.c.bf16 %v1256_v27, %v1255_v18  ;;  %v1257_v37 = vsel %vm2208_vm6, 1.0, %v2605_v32  ;;  %v2653_v27 = vld [vmem:[#allocation10_spill] sm:$0xff] }
 0x176   :  { %vm2575_vm0 = vmpackc.low %vm2141_vm1, %vm2133_vm15  ;;  %v1258_v11 = vsel %vm2214_vm11, 1.0, %v2605_v32  ;;  %vm556_vm15 = vcmp.eq.s32.totalorder %v1987_v50, %v2064_v13  ;;  %vm557_vm1 = vcmp.eq.s32.totalorder %v1990_v54, %v2064_v13  ;;  %v2632_v50 = vmov 0 }
 0x177   :  { %vm2241_vm8 = vmand %vm554_vm9, %vm2060_vm2  ;;  %v613_v62 = vpack.c.bf16 %v1258_v11, %v1257_v37  ;;  %v2654_v37 = vld [vmem:[#allocation15_spill] sm:$0xff] }
 0x178   :  { %v2627_v34 = vsel %vm2241_vm8, 4294967295, %v2626_v34  ;;  %v1259_v35 = vsel %vm2241_vm8, 1.0, %v2605_v32  ;;  %vm2263_vm9 = vmand %vm556_vm15, %vm2060_vm2 }
 0x179   :  { %619 = vxpose.xlu0.c.b16.cont [4/8] %v611_v39, 128  ;;  %v2631_v30 = vsel %vm2263_vm9, 4294967295, %v2630_v30  ;;  %vm2583_vm12 = vmpackc.low %vm2159_vm4, %vm2153_vm3  ;;  %v1261_v58 = vsel %vm2263_vm9, 1.0, %v2605_v32 }
 0x17a   :  { %vm2579_vm15 = vmpackc.low %vm2214_vm11, %vm2208_vm6 }
 0x17b   :  { %1477 = vmatpush3.bf16.xpose.msk.msra.mxu0 %vm2575_vm0, %v1591_v26  ;;  %vm2247_vm0 = vmand %vm555_vm10, %vm2060_vm2 }
 0x17c   :  { %1478 = vmatprep.subr.bf16.mxu0 %v2605_v32  ;;  %v1260_v20 = vsel %vm2247_vm0, 1.0, %v2605_v32  ;;  %vm2269_vm10 = vmand %vm557_vm1, %vm2060_vm2 }
 0x17d   :  { %620 = vxpose.xlu0.c.b16.cont [5/8] %v612_v16, 128  ;;  %v2633_v50 = vsel %vm2269_vm10, 4294967295, %v2632_v50  ;;  %v614_v54 = vpack.c.bf16 %v1260_v20, %v1259_v35  ;;  %v1262_v28 = vsel %vm2269_vm10, 1.0, %v2605_v32  ;;  %vm2580_vm2 = vmpackc.low %vm2192_vm14, %vm2186_vm13  ;;  %v2656_v35 = vld [vmem:[#allocation11_spill] sm:$0xff] }
 0x17e   :  { %v615_v23 = vpack.c.bf16 %v1262_v28, %v1261_v58  ;;  %vm2582_vm1 = vmpackc.low %vm2247_vm0, %vm2241_vm8 }
 0x181   :  { %621 = vxpose.xlu0.c.b16.cont [6/8] %v613_v62, 128 }
 0x183   :  { %1479 = vmatpush3.bf16.xpose.msk.msra.mxu0 %vm2583_vm12, %v1591_v26 }
 0x184   :  { %1480 = vmatprep.subr.bf16.mxu0 %v2605_v32 }
 0x185   :  { %622 = vxpose.xlu0.c.b16.cont [7/8] %v614_v54, 128 }
 0x189   :  { %623 = vxpose.xlu0.c.b16.end [8/8] %v615_v23, 128  ;;  %v2657_v23 = vld [vmem:[#allocation12_spill] sm:$0xff] }
 0x18b   :  { %1481 = vmatpush3.bf16.xpose.msk.msra.mxu0 %vm2580_vm2, %v1591_v26  ;;  %vm1592_vm2 = vmmov 0  }
 0x18c   :  { %1482 = vmatprep.subr.bf16.mxu0 %v2605_v32  ;;  %1488 = vmatprep.mubr.msk.bf16.mxu0 %vm1592_vm2, %v2605_v32  ;;  %vm2634_vm2 = vmpackc.low %vm2084_vm7, %vm2076_vm5 }
 0x18d   :  { %vm2641_vm5 = vmpackc.low %vm2159_vm4, %vm2153_vm3  ;;  %vm2644_vm3 = vnez %v2627_v34  ;;  %v2655_v34 = vld [vmem:[#allocation17_spill] sm:$0xff] }
 0x18e   :  { %vm2642_vm7 = vmpackc.low %vm2192_vm14, %vm2186_vm13  ;;  %vm2647_vm13 = vnez %v2631_v30 }
 0x18f   :  { %vm2645_vm4 = vmpackc.low %vm2247_vm0, %vm2644_vm3 }
 0x193   :  { %1483 = vmatpush3.bf16.xpose.msk.msra.mxu0 %vm2579_vm15, %v1591_v26  ;;  %vm2581_vm15 = vmpackc.low %vm2269_vm10, %vm2263_vm9  ;;  %vm2638_vm9 = vnez %v2613_v53  ;;  %vm2639_vm10 = vnez %v2611_v22 }
 0x194   :  { %1484 = vmatprep.subr.bf16.mxu0 %v2605_v32  ;;  %vm2640_vm8 = vmpackc.low %vm2638_vm9, %vm2639_vm10 }
 0x19b   :  { %1485 = vmatpush3.bf16.xpose.msk.msra.mxu0 %vm2582_vm1, %v1591_v26  ;;  %vm2636_vm1 = vnez %v2607_v8 }
 0x19c   :  { %1486 = vmatprep.subr.bf16.mxu0 %v2605_v32 }
 0x1a3   :  { %1487 = vmatpush3.bf16.xpose.msk.msra.mxu0 %vm2581_vm15, %v1591_v26  ;;  %vm2635_vm15 = vnez %v2609_v25 }
 0x1a4   :  { %vm2637_vm12 = vmpackc.low %vm2635_vm15, %vm2636_vm1 }
 0x1aa   :  { %1489 = vmatmul.mubr.bf16.vlgmr.msra.gmra.mrb[16].mxu0 %v1593_v7 }
 0x1d3   :  { %v624_v13 = vpop.trf.xlu0 }
 0x1d4   :  { %1424 = vmatprep.mubr.bf16.mxu1 %v624_v13 }
 0x1d7   :  { %v625_v63 = vpop.trf.xlu0 }
 0x1d8   :  { %1425 = vmatmul.mubr.bf16.vlgmr.msra.gmra.mrb[0].mxu1 %v625_v63 }
 0x1d9   :  { %1441 = vmatpush3.bf16.msra.mxu1 %v1687_v9 }
 0x1da   :  { %1442 = vmatprep.subr.bf16.mxu1 %v1827_v42 }
 0x1db   :  { %v626_v60 = vpop.trf.xlu0 }
 0x1dc   :  { %1428 = vmatprep.mubr.bf16.mxu1 %v626_v60 }
 0x1dd   :  { %1443 = vmatpush3.bf16.msra.mxu1 %v1827_v42 }
 0x1de   :  { %1444 = vmatprep.subr.bf16.mxu1 %v1832_v43 }
 0x1df   :  { %v627_v59 = vpop.trf.xlu0 }
 0x1e0   :  { %1429 = vmatmul.mubr.bf16.gmra.mrb[4].mxu1 %v627_v59 }
 0x1e1   :  { %1445 = vmatpush3.bf16.msra.mxu1 %v1832_v43 }
 0x1e2   :  { %1446 = vmatprep.subr.bf16.mxu1 %v1839_v44 }
 0x1e3   :  { %v628_v57 = vpop.trf.xlu0 }
 0x1e4   :  { %1432 = vmatprep.mubr.bf16.mxu1 %v628_v57 }
 0x1e5   :  { %1447 = vmatpush3.bf16.msra.mxu1 %v1839_v44 }
 0x1e6   :  { %1448 = vmatprep.subr.bf16.mxu1 %v1844_v45 }
 0x1e7   :  { %v629_v9 = vpop.trf.xlu0 }
 0x1e8   :  { %1433 = vmatmul.mubr.bf16.gmra.mrb[8].mxu1 %v629_v9 }
 0x1e9   :  { %1449 = vmatpush3.bf16.msra.mxu1 %v1844_v45 }
 0x1ea   :  { %1450 = vmatprep.subr.bf16.mxu1 %v1851_v46 }
 0x1eb   :  { %v630_v42 = vpop.trf.xlu0 }
 0x1ec   :  { %1436 = vmatprep.mubr.bf16.mxu1 %v630_v42 }
 0x1ed   :  { %1451 = vmatpush3.bf16.msra.mxu1 %v1851_v46 }
 0x1ee   :  { %1452 = vmatprep.subr.bf16.mxu1 %v1856_v47 }
 0x1ef   :  { %v631_v43 = vpop.trf.xlu0 }
 0x1f0   :  { %1437 = vmatmul.mubr.bf16.gmra.mrb[12].mxu1 %v631_v43 }
 0x1f1   :  { %1453 = vmatpush3.bf16.msra.mxu1 %v1856_v47  ;;  %1456 = vmatprep.mubr.bf16.mxu1 %v624_v13  ;;  %v2649_v47 = vld [vmem:[#allocation9_spill] sm:$0xff] }
 0x1f2   :  { %1454 = vmatprep.subr.bf16.mxu1 %v1863_v48 }
 0x1f5   :  { %1455 = vmatpush3.bf16.msra.mxu1 %v1863_v48 }
 0x1f6   :  { %1492 = vmatprep.subr.bf16.mxu1 %v1662_v3 }
 0x1f8   :  { %1457 = vmatmul.mubr.bf16.vlgmr.msra.gmra.mrb[0].mxu1 %v625_v63 }
 0x1f9   :  { %1460 = vmatprep.mubr.bf16.mxu1 %v626_v60  ;;  %1493 = vmatpush3.bf16.msra.mxu1 %v1662_v3  ;;  %v2658_v60 = vld [vmem:[#allocation14_spill] sm:$0xff] }
 0x1fa   :  { %1494 = vmatprep.subr.bf16.mxu1 %v1671_v6 }
 0x1fd   :  { %1495 = vmatpush3.bf16.msra.mxu1 %v1671_v6 }
 0x1fe   :  { %1496 = vmatprep.subr.bf16.mxu1 %v1691_v10 }
 0x200   :  { %1461 = vmatmul.mubr.bf16.gmra.mrb[4].mxu1 %v627_v59 }
 0x201   :  { %1464 = vmatprep.mubr.bf16.mxu1 %v628_v57  ;;  %1497 = vmatpush3.bf16.msra.mxu1 %v1691_v10 }
 0x202   :  { %1498 = vmatprep.subr.bf16.mxu1 %v1719_v17 }
 0x205   :  { %1499 = vmatpush3.bf16.msra.mxu1 %v1719_v17 }
 0x206   :  { %1500 = vmatprep.subr.bf16.mxu1 %v1747_v24 }
 0x208   :  { %1465 = vmatmul.mubr.bf16.gmra.mrb[8].mxu1 %v629_v9 }
 0x209   :  { %1468 = vmatprep.mubr.bf16.mxu1 %v630_v42  ;;  %1501 = vmatpush3.bf16.msra.mxu1 %v1747_v24 }
 0x20a   :  { %1502 = vmatprep.subr.bf16.mxu1 %v1775_v31 }
 0x20d   :  { %1503 = vmatpush3.bf16.msra.mxu1 %v1775_v31 }
 0x20e   :  { %1504 = vmatprep.subr.bf16.mxu1 %v1803_v38 }
 0x210   :  { %1469 = vmatmul.mubr.bf16.gmra.mrb[12].mxu1 %v631_v43 }
 0x211   :  { %1505 = vmatpush3.bf16.msra.mxu1 %v1803_v38  ;;  %1508 = vmatprep.mubr.msk.bf16.mxu1 %vm2634_vm2, %v1591_v26 }
 0x212   :  { %1506 = vmatprep.subr.bf16.mxu1 %v1819_v41 }
 0x215   :  { %1507 = vmatpush3.bf16.msra.mxu1 %v1819_v41 }
 0x218   :  { %1509 = vmatmul.mubr.msk.bf16.vlgmr.msra.gmra.mrb[16].mxu1 %vm2637_vm12, %v1591_v26  ;;  %vm2643_vm12 = vmpackc.low %vm2214_vm11, %vm2208_vm6  ;;  %vm93_vm6 = vcmask 0  }
 0x219   :  { %1512 = vmatprep.mubr.msk.bf16.mxu1 %vm2640_vm8, %v1591_v26  ;;  %vm2646_vm8 = vnez %v2633_v50  ;;  %94 = vst.msk [vmem:[#allocation4] sm:$0x1] %vm93_vm6, %v2605_v32 }
 0x21a   :  { %vm2648_vm14 = vmpackc.low %vm2646_vm8, %vm2647_vm13 }
 0x220   :  { %1513 = vmatmul.mubr.msk.bf16.gmra.mrb[20].mxu1 %vm2641_vm5, %v1591_v26 }
 0x221   :  { %1516 = vmatprep.mubr.msk.bf16.mxu1 %vm2642_vm7, %v1591_v26 }
 0x228   :  { %1517 = vmatmul.mubr.msk.bf16.gmra.mrb[24].mxu1 %vm2643_vm12, %v1591_v26 }
 0x229   :  { %1520 = vmatprep.mubr.msk.bf16.mxu1 %vm2645_vm4, %v1591_v26 }
 0x230   :  { %1521 = vmatmul.mubr.msk.bf16.gmra.mrb[28].mxu1 %vm2648_vm14, %v1591_v26  ;;  %v2650_v26 = vld [vmem:[#allocation8_spill] sm:$0xff] }
 0x2cb   :  { %v1458_v3 = vpop.f32.mrb[0].mxu1 }
 0x2cc   :  { %v1013_v6 = vsub.f32 %v1458_v3, %v1658_v2  ;;  %1098 = vst [vmem:[%s2553_s5 + $0x10] sm:$0xff] %v1458_v3  ;;  %v811_v10 = vpop.f32.mrb[1].mxu1  ;;  %v2659_v3 = vld [vmem:[#allocation16_spill] sm:$0xff] }
 0x2cd   :  { %1096 = vst [vmem:[%s2553_s5] sm:$0xff] %v811_v10  ;;  %v1459_v17 = vpop.f32.mrb[2].mxu1  ;;  %v1011_v24 = vsub.f32 %v811_v10, %v1648_v0 }
 0x2ce   :  { %1099 = vst [vmem:[%s2553_s5 + $0x18] sm:$0xff] %v1459_v17  ;;  %v814_v31 = vpop.f32.mrb[3].mxu1  ;;  %v1029_v38 = vmul.f32 %v1013_v6, %v1013_v6  ;;  %v1014_v2 = vsub.f32 %v1459_v17, %v1667_v4 }
 0x2cf   :  { %1097 = vst [vmem:[%s2553_s5 + $0x8] sm:$0xff] %v814_v31  ;;  %v1027_v41 = vmul.f32 %v1011_v24, %v1011_v24  ;;  %v1012_v46 = vsub.f32 %v814_v31, %v1653_v1 }
 0x2d0   :  { %1047 = vadd.xlane.f32.xlu1 %v1029_v38  ;;  %v1030_v14 = vmul.f32 %v1014_v2, %v1014_v2 }
 0x2d1   :  { %v1028_v25 = vmul.f32 %v1012_v46, %v1012_v46 }
 0x2d3   :  { %v1462_v44 = vpop.f32.mrb[4].mxu1 }
 0x2d4   :  { %1102 = vst [vmem:[%s2553_s5 + $0x30] sm:$0xff] %v1462_v44  ;;  %1043 = vadd.xlane.f32.xlu1 %v1027_v41  ;;  %v827_v0 = vpop.f32.mrb[5].mxu1  ;;  %v1017_v8 = vsub.f32 %v1462_v44, %v2650_v26 }
 0x2d5   :  { %1100 = vst [vmem:[%s2553_s5 + $0x20] sm:$0xff] %v827_v0  ;;  %v1463_v45 = vpop.f32.mrb[6].mxu1  ;;  %v1015_v53 = vsub.f32 %v827_v0, %v2651_v61 }
 0x2d6   :  { %v1018_v48 = vsub.f32 %v1463_v45, %v2649_v47  ;;  %1103 = vst [vmem:[%s2553_s5 + $0x38] sm:$0xff] %v1463_v45  ;;  %v830_v4 = vpop.f32.mrb[7].mxu1  ;;  %v1033_v29 = vmul.f32 %v1017_v8, %v1017_v8  ;;  %v908_v47 = vpop.f32.mrb[16].mxu0 }
 0x2d7   :  { %1101 = vst [vmem:[%s2553_s5 + $0x28] sm:$0xff] %v830_v4  ;;  %v1016_v55 = vsub.f32 %v830_v4, %v1564_v15  ;;  %v1031_v33 = vmul.f32 %v1015_v53, %v1015_v53 }
 0x2d8   :  { %1049 = vadd.xlane.f32.xlu1 %v1030_v14  ;;  %v1034_v56 = vmul.f32 %v1018_v48, %v1018_v48  ;;  %v1113_v48 = vld [vmem:[%s2555_s7] sm:$0x1]  ;;  %v1490_v14 = vpop.f32.mrb[17].mxu0 }
 0x2d9   :  { %v1032_v16 = vmul.f32 %v1016_v55, %v1016_v55  ;;  %v1114_v4 = vadd.f32 %v1113_v48, %v908_v47 }
 0x2da   :  { %1057 = vadd.xlane.f32.xlu0 %v1034_v56  ;;  %v911_v56 = vpop.f32.mrb[18].mxu0 }
 0x2db   :  { %v1466_v51 = vpop.f32.mrb[8].mxu1  ;;  %1115 = vst [vmem:[%s2555_s7] sm:$0x1] %v1114_v4  ;;  %v1491_v26 = vpop.f32.mrb[19].mxu0  ;;  %s1594_s7 = smov [#allocation4]  }
 0x2dc   :  { %1106 = vst [vmem:[%s2553_s5 + $0x50] sm:$0xff] %v1466_v51  ;;  %1045 = vadd.xlane.f32.xlu1 %v1028_v25  ;;  %v843_v1 = vpop.f32.mrb[9].mxu1  ;;  %v1021_v7 = vsub.f32 %v1466_v51, %v2657_v23 }
 0x2dd   :  { %1104 = vst [vmem:[%s2553_s5 + $0x40] sm:$0xff] %v843_v1  ;;  %v1467_v22 = vpop.f32.mrb[10].mxu1  ;;  %v1019_v21 = vsub.f32 %v843_v1, %v2653_v27 }
 0x2de   :  { %v1022_v12 = vsub.f32 %v1467_v22, %v2652_v19  ;;  %1107 = vst [vmem:[%s2553_s5 + $0x58] sm:$0xff] %v1467_v22  ;;  %v846_v36 = vpop.f32.mrb[11].mxu1  ;;  %v1037_v57 = vmul.f32 %v1021_v7, %v1021_v7  ;;  %v1164_v7 = vld [vmem:[#allocation4] sm:$0x1] }
 0x2df   :  { %1105 = vst [vmem:[%s2553_s5 + $0x48] sm:$0xff] %v846_v36  ;;  %v1020_v20 = vsub.f32 %v846_v36, %v2656_v35  ;;  %v1035_v30 = vmul.f32 %v1019_v21, %v1019_v21 }
 0x2e0   :  { %1055 = vadd.xlane.f32.xlu1 %v1033_v29  ;;  %v1038_v52 = vmul.f32 %v1022_v12, %v1022_v12 }
 0x2e1   :  { %v1036_v63 = vmul.f32 %v1020_v20, %v1020_v20 }
 0x2e2   :  { %1065 = vadd.xlane.f32.xlu0 %v1038_v52 }
 0x2e3   :  { %v1470_v49 = vpop.f32.mrb[12].mxu1 }
 0x2e4   :  { %1110 = vst [vmem:[%s2553_s5 + $0x70] sm:$0xff] %v1470_v49  ;;  %1051 = vadd.xlane.f32.xlu1 %v1031_v33  ;;  %v859_v39 = vpop.f32.mrb[13].mxu1  ;;  %v1025_v6 = vsub.f32 %v1470_v49, %v2659_v3 }
 0x2e5   :  { %1108 = vst [vmem:[%s2553_s5 + $0x60] sm:$0xff] %v859_v39  ;;  %v1471_v18 = vpop.f32.mrb[14].mxu1  ;;  %v1023_v59 = vsub.f32 %v859_v39, %v2658_v60 }
 0x2e6   :  { %1111 = vst [vmem:[%s2553_s5 + $0x78] sm:$0xff] %v1471_v18  ;;  %v862_v5 = vpop.f32.mrb[15].mxu1  ;;  %v1026_v40 = vsub.f32 %v1471_v18, %v2655_v34  ;;  %v1041_v24 = vmul.f32 %v1025_v6, %v1025_v6 }
 0x2e7   :  { %v1024_v11 = vsub.f32 %v862_v5, %v2654_v37  ;;  %1109 = vst [vmem:[%s2553_s5 + $0x68] sm:$0xff] %v862_v5  ;;  %v1039_v17 = vmul.f32 %v1023_v59, %v1023_v59 }
 0x2e8   :  { %1053 = vadd.xlane.f32.xlu1 %v1032_v16  ;;  %v1042_v28 = vmul.f32 %v1026_v40, %v1026_v40 }
 0x2e9   :  { %v1040_v62 = vmul.f32 %v1024_v11, %v1024_v11 }
 0x2eb   :  { %1069 = vadd.xlane.f32.xlu0 %v1040_v62  ;;  %v1510_v50 = vpop.f32.mrb[16].mxu1 }
 0x2ec   :  { %1059 = vadd.xlane.f32.xlu1 %v1035_v30  ;;  %v948_v54 = vpop.f32.mrb[17].mxu1  ;;  %1150 = vst [vmem:[%s2556_s8 + $0x10] sm:$0xff] %v1510_v50 }
 0x2ed   :  { %v1511_v58 = vpop.f32.mrb[18].mxu1  ;;  %1148 = vst [vmem:[%s2556_s8] sm:$0xff] %v948_v54 }
 0x2ee   :  { %v951_v13 = vpop.f32.mrb[19].mxu1  ;;  %1151 = vst [vmem:[%s2556_s8 + $0x18] sm:$0xff] %v1511_v58 }
 0x2ef   :  { %1073 = vadd.xlane.f32.xlu0 %v1042_v28  ;;  %1149 = vst [vmem:[%s2556_s8 + $0x8] sm:$0xff] %v951_v13 }
 0x2f0   :  { %1061 = vadd.xlane.f32.xlu1 %v1036_v63 }
 0x2f3   :  { %v1514_v9 = vpop.f32.mrb[20].mxu1 }
 0x2f4   :  { %1063 = vadd.xlane.f32.xlu1 %v1037_v57  ;;  %v964_v42 = vpop.f32.mrb[21].mxu1  ;;  %1154 = vst [vmem:[%s2556_s8 + $0x30] sm:$0xff] %v1514_v9 }
 0x2f5   :  { %v1515_v43 = vpop.f32.mrb[22].mxu1  ;;  %1152 = vst [vmem:[%s2556_s8 + $0x20] sm:$0xff] %v964_v42 }
 0x2f6   :  { %v967_v10 = vpop.f32.mrb[23].mxu1  ;;  %1155 = vst [vmem:[%s2556_s8 + $0x38] sm:$0xff] %v1515_v43 }
 0x2f7   :  { %1153 = vst [vmem:[%s2556_s8 + $0x28] sm:$0xff] %v967_v10 }
 0x2f8   :  { %1067 = vadd.xlane.f32.xlu1 %v1039_v17 }
 0x2fb   :  { %v1518_v31 = vpop.f32.mrb[24].mxu1 }
 0x2fc   :  { %1071 = vadd.xlane.f32.xlu1 %v1041_v24  ;;  %v980_v38 = vpop.f32.mrb[25].mxu1  ;;  %1158 = vst [vmem:[%s2556_s8 + $0x50] sm:$0xff] %v1518_v31 }
 0x2fd   :  { %v1519_v2 = vpop.f32.mrb[26].mxu1  ;;  %1156 = vst [vmem:[%s2556_s8 + $0x40] sm:$0xff] %v980_v38 }
 0x2fe   :  { %v983_v41 = vpop.f32.mrb[27].mxu1  ;;  %1159 = vst [vmem:[%s2556_s8 + $0x58] sm:$0xff] %v1519_v2 }
 0x2ff   :  { %1157 = vst [vmem:[%s2556_s8 + $0x48] sm:$0xff] %v983_v41 }
 0x303   :  { %v1522_v44 = vpop.f32.mrb[28].mxu1 }
 0x304   :  { %v996_v0 = vpop.f32.mrb[29].mxu1  ;;  %1162 = vst [vmem:[%s2556_s8 + $0x70] sm:$0xff] %v1522_v44 }
 0x305   :  { %v1523_v45 = vpop.f32.mrb[30].mxu1  ;;  %1160 = vst [vmem:[%s2556_s8 + $0x60] sm:$0xff] %v996_v0 }
 0x306   :  { %v999_v46 = vpop.f32.mrb[31].mxu1  ;;  %1163 = vst [vmem:[%s2556_s8 + $0x78] sm:$0xff] %v1523_v45 }
 0x307   :  { %1161 = vst [vmem:[%s2556_s8 + $0x68] sm:$0xff] %v999_v46  ;;  %s1195_s8 = sshll.u32 %s1594_s7, 4  ;;  %s1196_s8 = int_to_ptr.vmem [resolvable:$true] %s1195_s8 }
 0x308   :  { %s1565_s12 = scalar_lea.vmem %s1196_s8, 16  ;;  %s1569_s13 = scalar_lea.vmem %s1196_s8, 32 }
 0x309   :  { %p1566_p0 = scmp.ne.s32.totalorder %s1196_s8, %s1565_s12  ;;  %p1570_p1 = scmp.lt.s32.totalorder %s1196_s8, %s1196_s8 }
 0x30a   :  { %p1571_p2 = scmp.lt.s32.totalorder %s1569_s13, %s1565_s12 }
 0x30c   :  { %p1572_p3 = por %p1571_p2, %p1570_p1 }
 0x30e   :  { %p1573_p4 = pnand %p1572_p3, %p1566_p0 }
 0x35d   :  { %v1048_v8 = vpop.xlane.xlu1 %1047 }
 0x361   :  { %v1044_v25 = vpop.xlane.xlu1 %1043 }
 0x365   :  { %v1050_v51 = vpop.xlane.xlu1 %1049 }
 0x367   :  { %v1058_v32 = vpop.xlane.xlu0 %1057 }
 0x369   :  { %v1046_v1 = vpop.xlane.xlu1 %1045 }
 0x36a   :  { %v1075_v22 = vadd.f32 %v1046_v1, %v1044_v25 }
 0x36c   :  { %v1076_v53 = vadd.f32 %v1075_v22, %v1048_v8 }
 0x36d   :  { %v1056_v61 = vpop.xlane.xlu1 %1055 }
 0x36e   :  { %v1077_v12 = vadd.f32 %v1076_v53, %v1050_v51 }
 0x36f   :  { %v1066_v27 = vpop.xlane.xlu0 %1065 }
 0x371   :  { %v1052_v19 = vpop.xlane.xlu1 %1051 }
 0x372   :  { %v1078_v36 = vadd.f32 %v1077_v12, %v1052_v19 }
 0x375   :  { %v1054_v29 = vpop.xlane.xlu1 %1053 }
 0x376   :  { %v1079_v52 = vadd.f32 %v1078_v36, %v1054_v29 }
 0x378   :  { %v1080_v15 = vadd.f32 %v1079_v52, %v1056_v61  ;;  %v1070_v37 = vpop.xlane.xlu0 %1069 }
 0x379   :  { %v1060_v55 = vpop.xlane.xlu1 %1059 }
 0x37a   :  { %v1081_v33 = vadd.f32 %v1080_v15, %v1058_v32 }
 0x37c   :  { %v1082_v49 = vadd.f32 %v1081_v33, %v1060_v55  ;;  %v1074_v20 = vpop.xlane.xlu0 %1073 }
 0x37d   :  { %v1062_v39 = vpop.xlane.xlu1 %1061 }
 0x37e   :  { %v1083_v18 = vadd.f32 %v1082_v49, %v1062_v39 }
 0x381   :  { %v1064_v21 = vpop.xlane.xlu1 %1063 }
 0x382   :  { %v1084_v5 = vadd.f32 %v1083_v18, %v1064_v21 }
 0x384   :  { %v1085_v16 = vadd.f32 %v1084_v5, %v1066_v27 }
 0x385   :  { %v1068_v11 = vpop.xlane.xlu1 %1067 }
 0x386   :  { %v1086_v34 = vadd.f32 %v1085_v16, %v1068_v11 }
 0x388   :  { %v1087_v40 = vadd.f32 %v1086_v34, %v1070_v37 }
 0x389   :  { %v1072_v62 = vpop.xlane.xlu1 %1071 }
 0x38a   :  { %v1088_v35 = vadd.f32 %v1087_v40, %v1072_v62 }
 0x38c   :  { %v1089_v30 = vadd.f32 %v1088_v35, %v1074_v20 }
 0x38e   :  { %v1090_v50 = vrot.slane %v1089_v30, 4 }
 0x390   :  { %v1091_v54 = vadd.f32 %v1090_v50, %v1089_v30 }
 0x392   :  { %v1092_v58 = vrot.slane %v1091_v54, 2 }
 0x394   :  { %v1093_v28 = vadd.f32 %v1092_v58, %v1091_v54 }
 0x396   :  { %v1094_v23 = vrot.slane %v1093_v28, 1 }
 0x398   :  { %v1095_v13 = vadd.f32 %v1094_v23, %v1093_v28 }
 0x39a   :  { %v1165_v63 = vadd.f32 %v1164_v7, %v1095_v13 }
 0x39c   :  { %1167 = vst.msk [vmem:[#allocation4] sm:$0x1] %vm93_vm6, %v1165_v63 }
 0x39d   :  { %1576 = shalt.err (!%p1573_p4)
}
 0x39e   :  { %s1577_s16 = scalar_lea.hbm %s2557_s9, 16 }
 0x39f   :  { %p1578_p5 = scmp.ne.s32.totalorder %s2557_s9, %s1577_s16  ;;  %p1581_p6 = scmp.lt.u32.totalorder %s1577_s16, %s2557_s9 }
 0x3a1   :  { %p1583_p7 = pnand %p1581_p6, %p1578_p5 }
 0x3a3   :  { %1586 = shalt.err (!%p1583_p7)
}
 0x3a4   :  { %1198 = dma.vmem_to_hbm [thread:$0]  %s1196_s8, 16, %s2557_s9, [#allocation5]  }
 0x3a5   :  { %1587 = dma.done.wait [#allocation5], 16  }
 0x3a6   :  { %1588 = vsyncadd [#allocation5], 4294967280 }
 0x3a7   :  { %1220 = vsyncpa [#allocation5], 1 }

</bundles_post_ra>
